<compile_context>
chip_gen: v7x
topology: tpu7x:2x2x1
jax: 0.10.0
libtpu: 0.0.40
codegen_flags: <defaults>
</compile_context>

<pallas_src>
import math

import jax
import jax.numpy as jnp
import numpy as np
from jax.experimental import pallas as pl
from jax.experimental.pallas import tpu as pltpu


# --------------------------------------------------------------------------
# Pallas kernel: lane-dense edge attention + FC + residual LN + FFN + LN
# --------------------------------------------------------------------------
def _spatial_att_edge_kernel(
    xq_ref, xk_ref, xv_ref, mask_ref,
    wq_ref, bq_ref, wk_ref, bk_ref, wv_ref, bv_ref,
    hsum_ref, eden_ref, hbc_ref, hred_ref,
    wfc_ref, bfc_ref, g1_ref, be1_ref,
    w1_ref, b1_ref, w2_ref, b2_ref, g2_ref, be2_ref,
    out_ref):
  f32 = jnp.float32
  xq = xq_ref[...]                      # (TM, H)      f32 (also the residual)
  xk = xk_ref[...]                      # (TM, N*H)    stream dtype, lane-dense
  xv = xv_ref[...]                      # (TM, N*H)
  mask = mask_ref[...]                  # (TM, N*heads) f32, column = n*heads+h

  # ---- K/V projections: block-diagonal weights, full-depth MXU contraction ----
  k = jnp.dot(xk, wk_ref[...], preferred_element_type=f32) + bk_ref[...]   # (TM, N*H)
  v = jnp.dot(xv, wv_ref[...], preferred_element_type=f32) + bv_ref[...]   # (TM, N*H)

  # ---- Q projection, replicated N times along lanes: q_t[m, n*H+j] = q[m, j] ----
  q_t = jnp.dot(xq, wq_ref[...], preferred_element_type=f32) + bq_ref[...]  # (TM, N*H)

  # ---- per-head scores, lane-dense (TM, N*heads); 1/sqrt(d_q) folded in hsum ----
  s = jnp.dot(q_t * k, hsum_ref[...], preferred_element_type=f32)           # (TM, N*heads)
  s = jnp.where(mask == 0.0, -1e9, s)   # exact masked_fill semantics

  # ---- softmax over the neighbor axis per head.  A per-row max is a valid
  #      stabilizer (softmax is shift-invariant within every (row, head) group). ----
  s = s - jnp.max(s, axis=-1, keepdims=True)
  p = jnp.exp(s)
  denom = jnp.dot(p, eden_ref[...], preferred_element_type=f32)             # per-head sums
  a = p / denom                                                             # (TM, N*heads)

  # ---- context: expand head weights to H lanes, weight V, reduce over neighbors ----
  a_full = jnp.dot(a, hbc_ref[...], preferred_element_type=f32)             # (TM, N*H)
  ctx = jnp.dot(a_full * v, hred_ref[...], preferred_element_type=f32)      # (TM, H)

  # ---- output projection, residual LayerNorms, FFN (dropout = identity) ----
  ctx = jnp.dot(ctx, wfc_ref[...], preferred_element_type=f32) + bfc_ref[...]

  def layer_norm(x, g, b):
    mu = jnp.mean(x, axis=-1, keepdims=True)
    var = jnp.mean((x - mu) ** 2, axis=-1, keepdims=True)
    return (x - mu) * jax.lax.rsqrt(var + 1e-5) * g + b

  x1 = layer_norm(ctx + xq, g1_ref[...], be1_ref[...])
  h = jnp.maximum(
      jnp.dot(x1, w1_ref[...], preferred_element_type=f32) + b1_ref[...], 0.0)
  y = jnp.dot(h, w2_ref[...], preferred_element_type=f32) + b2_ref[...]
  # Output stays (tm, H); the narrow store is accepted knowingly (output bytes
  # are a small fraction of the streamed input bytes).
  out_ref[...] = layer_norm(y + x1, g2_ref[...], be2_ref[...]).astype(out_ref.dtype)


# --------------------------------------------------------------------------
# Tile selection: largest row tile whose working set fits the VMEM budget.
# --------------------------------------------------------------------------
def _pick_tile(M, N, H, heads, d_ff, stream_itemsize, requested_tm, budget_bytes):
  lane = 128

  def padded(d, item=4):                 # bytes of one lane-padded row
    return -(-d // lane) * lane * item

  NH = N * H
  NHh = N * heads
  # Streamed tiles (double-buffered by the pipeline).
  per_row = 2 * (padded(H)                          # xq
                 + 2 * padded(NH, stream_itemsize)  # xk, xv (lane-dense slabs)
                 + padded(NHh)                      # mask
                 + padded(H))                       # out
  # f32 intermediates (compiler reuses buffers; modest over-count only).
  per_row += (2 * padded(NH)                        # k, v projections
              + 4 * padded(NH)                      # q_t, q_t*k, a_full, a_full*v
              + 5 * padded(NHh)                     # scores / softmax temps
              + 4 * padded(max(H, d_ff)))           # ctx, x1, ffn hidden, y
  fixed = 4 * 2 ** 20                               # full-block weights (kron etc.)

  tm = max(8, min(requested_tm, max(budget_bytes - fixed, 2 ** 20) // per_row, M))
  # Megacore: keep >= 4 grid steps (>= 2 pipelined steps per TC on v7x) when M allows.
  if M >= 32:
    tm = min(tm, max(8, (-(-M // 4)) // 8 * 8))
  tm = -(-tm // 8) * 8                               # sublane granularity
  return tm


# --------------------------------------------------------------------------
# Wrapper: flatten (B,T,N) -> M rows, lane-dense slabs, tile M, weights as kron.
# --------------------------------------------------------------------------
def spatial_att_edge(input_Q, input_K, input_V, distances_mask, params,
                     *, heads, tm=2048, stream_dtype=jnp.float32):
  B, T, N, H = input_Q.shape
  d_q = H // heads
  d_ff = params["w1"].shape[0]
  NH = N * H
  NHh = N * heads
  M = B * T * N
  f32 = jnp.float32
  stream_bytes = jnp.dtype(stream_dtype).itemsize

  # ---- per-generation VMEM budgeting (v5e/v6e: 128 MiB; v7x: 64 MiB per TC) ----
  try:
    vmem_cap = int(pltpu.get_tpu_info().vmem_capacity_bytes)
  except Exception:
    vmem_cap = 64 * 2 ** 20             # conservative fallback
  if vmem_cap >= 100 * 2 ** 20:
    budget = 72 * 2 ** 20               # 128 MiB parts: big tiles amortize step cost
  else:
    budget = 36 * 2 ** 20               # v7x: stay well under 64 MiB / TC
  budget = min(budget, vmem_cap * 3 // 5)
  vmem_limit = int(min(vmem_cap * 7 // 8, budget + 16 * 2 ** 20))

  tm = _pick_tile(M, N, H, heads, d_ff, stream_bytes, tm, budget)
  grid_m = -(-M // tm)
  Mp = grid_m * tm

  # ---- lane-dense flattening: every row carries its full neighbor slab ----
  xq = input_Q.reshape(M, H).astype(f32)
  xk = input_K.reshape(M, NH)           # free reshape of contiguous memory
  xv = input_V.reshape(M, NH)
  mask = jnp.asarray(distances_mask, f32).reshape(B, T, N, -1, N)
  hm = mask.shape[3]
  if hm == 1:
    mask_nh = jnp.repeat(mask.reshape(M, N), heads, axis=1)     # col = n*heads + h
  else:                                                          # per-head mask
    mask_nh = mask.reshape(M, hm, N).transpose(0, 2, 1).reshape(M, N * hm)
  if Mp > M:
    pad = Mp - M
    xq = jnp.pad(xq, ((0, pad), (0, 0)))
    xk = jnp.pad(xk, ((0, pad), (0, 0)))
    xv = jnp.pad(xv, ((0, pad), (0, 0)))
    mask_nh = jnp.pad(mask_nh, ((0, pad), (0, 0)))   # fully masked -> harmless
  if stream_dtype != f32:
    # TODO(synk): accept bf16/fp8 input_K / input_V straight from the producer
    # to avoid this standalone cast pass over the largest tensors (v5e cares).
    xk = xk.astype(stream_dtype)
    xv = xv.astype(stream_dtype)

  # ---- weights pre-transposed to (in, out); structural matrices via kron/tile ----
  def wT(w):
    return jnp.asarray(w, f32).T

  def row(v):
    return jnp.asarray(v, f32).reshape(1, -1)

  eyeN = jnp.eye(N, dtype=f32)
  wk_bd = jnp.kron(eyeN, wT(params["wk"])).astype(stream_dtype)   # (NH, NH) block-diag
  wv_bd = jnp.kron(eyeN, wT(params["wv"])).astype(stream_dtype)
  bk_t = jnp.tile(jnp.asarray(params["bk"], f32), N).reshape(1, NH)
  bv_t = jnp.tile(jnp.asarray(params["bv"], f32), N).reshape(1, NH)
  wq_t = jnp.tile(wT(params["wq"]), (1, N))                       # (H, NH)
  bq_t = jnp.tile(jnp.asarray(params["bq"], f32), N).reshape(1, NH)

  head_ind = (jnp.arange(H)[:, None] // d_q ==
              jnp.arange(heads)[None, :]).astype(f32)             # (H, heads)
  hsum = jnp.kron(eyeN, head_ind / math.sqrt(d_q))                # (NH, N*heads)
  eden = jnp.tile(jnp.eye(heads, dtype=f32), (N, N))              # (N*heads, N*heads)
  hbc = jnp.kron(eyeN, head_ind.T)                                # (N*heads, NH)
  hred = jnp.tile(jnp.eye(H, dtype=f32), (N, 1))                  # (NH, H)

  flat_params = (
      wq_t, bq_t, wk_bd, bk_t, wv_bd, bv_t,
      hsum, eden, hbc, hred,
      wT(params["wfc"]), row(params["bfc"]),
      row(params["g1"]), row(params["be1"]),
      wT(params["w1"]), row(params["b1"]),
      wT(params["w2"]), row(params["b2"]),
      row(params["g2"]), row(params["be2"]),
  )

  def full_spec(shape):
    nd = len(shape)
    return pl.BlockSpec(shape, lambda i, _nd=nd: (0,) * _nd)

  in_specs = [
      pl.BlockSpec((tm, H), lambda i: (i, 0)),       # xq
      pl.BlockSpec((tm, NH), lambda i: (i, 0)),      # xk (lane-dense slab)
      pl.BlockSpec((tm, NH), lambda i: (i, 0)),      # xv (lane-dense slab)
      pl.BlockSpec((tm, NHh), lambda i: (i, 0)),     # mask (per-head columns)
  ] + [full_spec(p.shape) for p in flat_params]

  # ---- advisory cost estimate for XLA's scheduler ----
  flops_per_row = (2 * NH * NH * 2         # K, V block-diag projections
                   + 2 * H * NH            # Q replicated projection
                   + 2 * NH * NHh          # head-sum scores
                   + 2 * NHh * NHh         # softmax denominator expand
                   + 2 * NHh * NH          # head broadcast
                   + 2 * NH * H            # neighbor reduce
                   + 2 * H * H             # fc
                   + 2 * H * d_ff * 2      # FFN
                   + 8 * NH + 16 * max(H, d_ff))
  transcendentals = Mp * (NHh + 2)
  bytes_accessed = (2 * Mp * H * 4
                    + 2 * Mp * NH * stream_bytes
                    + Mp * NHh * 4
                    + sum(int(p.size) * p.dtype.itemsize for p in flat_params))
  cost = pl.CostEstimate(flops=int(Mp * flops_per_row),
                         transcendentals=int(transcendentals),
                         bytes_accessed=int(bytes_accessed))

  out = pl.pallas_call(
      _spatial_att_edge_kernel,
      out_shape=jax.ShapeDtypeStruct((Mp, H), input_Q.dtype),
      grid=(grid_m,),
      in_specs=in_specs,
      out_specs=pl.BlockSpec((tm, H), lambda i: (i, 0)),
      compiler_params=pltpu.CompilerParams(
          dimension_semantics=("parallel",),
          vmem_limit_bytes=vmem_limit),
      cost_estimate=cost,
  )(xq, xk, xv, mask_nh, *flat_params)

  return out[:M].reshape(B, T, N, H)


# --------------------------------------------------------------------------
# Pure-JAX reference mirroring the PyTorch forward exactly (eval mode).
# --------------------------------------------------------------------------
def reference(input_Q, input_K, input_V, distances_mask, p, *, heads):
  B, T, N, H = input_Q.shape
  dq = H // heads
  residual = input_Q
  q_in = input_Q[:, :, :, None, :]                                   # (B,T,N,1,H)
  Q = (q_in @ p["wq"].T + p["bq"]).reshape(B, T, N, 1, heads, dq).transpose(0, 1, 2, 4, 3, 5)
  K = (input_K @ p["wk"].T + p["bk"]).reshape(B, T, N, N, heads, dq).transpose(0, 1, 2, 4, 3, 5)
  V = (input_V @ p["wv"].T + p["bv"]).reshape(B, T, N, N, heads, dq).transpose(0, 1, 2, 4, 3, 5)
  att = jnp.matmul(Q, jnp.swapaxes(K, -1, -2)) / math.sqrt(dq)       # (B,T,N,h,1,N)
  att = jnp.where(distances_mask == 0, -1e9, att)
  att = jax.nn.softmax(att, axis=-1)
  ctx = jnp.matmul(att, V)                                           # (B,T,N,h,1,dq)
  ctx = jnp.swapaxes(ctx, 3, 4).reshape(B, T, N, H)
  ctx = ctx @ p["wfc"].T + p["bfc"]

  def ln(x, g, b):
    mu = x.mean(-1, keepdims=True)
    var = ((x - mu) ** 2).mean(-1, keepdims=True)
    return (x - mu) / jnp.sqrt(var + 1e-5) * g + b

  x1 = ln(ctx + residual, p["g1"], p["be1"])
  hf = jax.nn.relu(x1 @ p["w1"].T + p["b1"])
  y = hf @ p["w2"].T + p["b2"]
  return ln(y + x1, p["g2"], p["be2"])


# --------------------------------------------------------------------------
if __name__ == "__main__":
  B, T, N, H, heads = 2, 4, 8, 32, 4
  d_ff = 2 * H

  key = jax.random.PRNGKey(0)
  keys = jax.random.split(key, 20)

  def lin(kw, kb, out_dim, in_dim):
    bound = 1.0 / math.sqrt(in_dim)
    w = jax.random.uniform(kw, (out_dim, in_dim), jnp.float32, -bound, bound)
    b = jax.random.uniform(kb, (out_dim,), jnp.float32, -bound, bound)
    return w, b

  wq, bq = lin(keys[0], keys[1], H, H)
  wk, bk = lin(keys[2], keys[3], H, H)
  wv, bv = lin(keys[4], keys[5], H, H)
  wfc, bfc = lin(keys[6], keys[7], H, H)
  w1, b1 = lin(keys[8], keys[9], d_ff, H)
  w2, b2 = lin(keys[10], keys[11], H, d_ff)
  params = dict(
      wq=wq, bq=bq, wk=wk, bk=bk, wv=wv, bv=bv, wfc=wfc, bfc=bfc,
      g1=jnp.ones((H,), jnp.float32), be1=jnp.zeros((H,), jnp.float32),
      w1=w1, b1=b1, w2=w2, b2=b2,
      g2=jnp.ones((H,), jnp.float32), be2=jnp.zeros((H,), jnp.float32),
  )

  input_Q = jax.random.normal(keys[12], (B, T, N, H), jnp.float32)
  input_K = jax.random.normal(keys[13], (B, T, N, N, H), jnp.float32)
  input_V = jax.random.normal(keys[14], (B, T, N, N, H), jnp.float32)
  distances_mask = jax.random.bernoulli(keys[15], 0.7,
                                        (B, T, N, 1, 1, N)).astype(jnp.float32)

  # ---- default f32 streaming path: exact module semantics ----
  out_f32 = jax.block_until_ready(
      spatial_att_edge(input_Q, input_K, input_V, distances_mask, params,
                       heads=heads, stream_dtype=jnp.float32))
  ref_f32 = jax.block_until_ready(
      reference(input_Q, input_K, input_V, distances_mask, params, heads=heads))
  if not np.allclose(np.asarray(out_f32), np.asarray(ref_f32), atol=1e-3, rtol=1e-3):
    raise AssertionError("f32 Pallas kernel output mismatch vs JAX reference")

  # ---- opt-in bf16 streaming path: compared against an identically-quantized ref ----
  out_bf16 = jax.block_until_ready(
      spatial_att_edge(input_Q, input_K, input_V, distances_mask, params,
                       heads=heads, stream_dtype=jnp.bfloat16))

  def qz(x):
    return jnp.asarray(x).astype(jnp.bfloat16).astype(jnp.float32)

  p_q = dict(params)
  p_q["wk"] = qz(params["wk"])
  p_q["wv"] = qz(params["wv"])
  ref_bf16 = jax.block_until_ready(
      reference(input_Q, qz(input_K), qz(input_V), distances_mask, p_q, heads=heads))
  if not np.allclose(np.asarray(out_bf16), np.asarray(ref_bf16), atol=5e-3, rtol=5e-3):
    raise AssertionError("bf16 Pallas kernel output mismatch vs quantized reference")

  print("KERNEL_OK")
</pallas_src>

<mosaic_0001>
module attributes {stable_mosaic.version = 11 : i64} {
  func.func @_spatial_att_edge_kernel(%arg0: i32, %arg1: memref<16x32xf32, #tpu.memory_space<vmem>>, %arg2: memref<16x256xf32, #tpu.memory_space<vmem>>, %arg3: memref<16x256xf32, #tpu.memory_space<vmem>>, %arg4: memref<16x32xf32, #tpu.memory_space<vmem>>, %arg5: memref<32x256xf32, #tpu.memory_space<vmem>>, %arg6: memref<1x256xf32, #tpu.memory_space<vmem>>, %arg7: memref<256x256xf32, #tpu.memory_space<vmem>>, %arg8: memref<1x256xf32, #tpu.memory_space<vmem>>, %arg9: memref<256x256xf32, #tpu.memory_space<vmem>>, %arg10: memref<1x256xf32, #tpu.memory_space<vmem>>, %arg11: memref<256x32xf32, #tpu.memory_space<vmem>>, %arg12: memref<32x32xf32, #tpu.memory_space<vmem>>, %arg13: memref<32x256xf32, #tpu.memory_space<vmem>>, %arg14: memref<256x32xf32, #tpu.memory_space<vmem>>, %arg15: memref<32x32xf32, #tpu.memory_space<vmem>>, %arg16: memref<1x32xf32, #tpu.memory_space<vmem>>, %arg17: memref<1x32xf32, #tpu.memory_space<vmem>>, %arg18: memref<1x32xf32, #tpu.memory_space<vmem>>, %arg19: memref<32x64xf32, #tpu.memory_space<vmem>>, %arg20: memref<1x64xf32, #tpu.memory_space<vmem>>, %arg21: memref<64x32xf32, #tpu.memory_space<vmem>>, %arg22: memref<1x32xf32, #tpu.memory_space<vmem>>, %arg23: memref<1x32xf32, #tpu.memory_space<vmem>>, %arg24: memref<1x32xf32, #tpu.memory_space<vmem>>, %arg25: memref<16x32xf32, #tpu.memory_space<vmem>>) attributes {dimension_semantics = [#tpu.dimension_semantics<parallel>], iteration_bounds = array<i64: 4>, scalar_prefetch = 0 : i64, scratch_operands = 0 : i64, tpu.core_type = #tpu.core_type<tc>, window_params = [{transform_indices = @transform_0, window_bounds = array<i64: 16, 32>}, {transform_indices = @transform_1, window_bounds = array<i64: 16, 256>}, {transform_indices = @transform_2, window_bounds = array<i64: 16, 256>}, {transform_indices = @transform_3, window_bounds = array<i64: 16, 32>}, {pipeline_mode = #tpu.pipeline_mode<synchronous>, transform_indices = @transform_4, window_bounds = array<i64: 32, 256>}, {pipeline_mode = #tpu.pipeline_mode<synchronous>, transform_indices = @transform_5, window_bounds = array<i64: 1, 256>}, {pipeline_mode = #tpu.pipeline_mode<synchronous>, transform_indices = @transform_6, window_bounds = array<i64: 256, 256>}, {pipeline_mode = #tpu.pipeline_mode<synchronous>, transform_indices = @transform_7, window_bounds = array<i64: 1, 256>}, {pipeline_mode = #tpu.pipeline_mode<synchronous>, transform_indices = @transform_8, window_bounds = array<i64: 256, 256>}, {pipeline_mode = #tpu.pipeline_mode<synchronous>, transform_indices = @transform_9, window_bounds = array<i64: 1, 256>}, {pipeline_mode = #tpu.pipeline_mode<synchronous>, transform_indices = @transform_10, window_bounds = array<i64: 256, 32>}, {pipeline_mode = #tpu.pipeline_mode<synchronous>, transform_indices = @transform_11, window_bounds = array<i64: 32, 32>}, {pipeline_mode = #tpu.pipeline_mode<synchronous>, transform_indices = @transform_12, window_bounds = array<i64: 32, 256>}, {pipeline_mode = #tpu.pipeline_mode<synchronous>, transform_indices = @transform_13, window_bounds = array<i64: 256, 32>}, {pipeline_mode = #tpu.pipeline_mode<synchronous>, transform_indices = @transform_14, window_bounds = array<i64: 32, 32>}, {pipeline_mode = #tpu.pipeline_mode<synchronous>, transform_indices = @transform_15, window_bounds = array<i64: 1, 32>}, {pipeline_mode = #tpu.pipeline_mode<synchronous>, transform_indices = @transform_16, window_bounds = array<i64: 1, 32>}, {pipeline_mode = #tpu.pipeline_mode<synchronous>, transform_indices = @transform_17, window_bounds = array<i64: 1, 32>}, {pipeline_mode = #tpu.pipeline_mode<synchronous>, transform_indices = @transform_18, window_bounds = array<i64: 32, 64>}, {pipeline_mode = #tpu.pipeline_mode<synchronous>, transform_indices = @transform_19, window_bounds = array<i64: 1, 64>}, {pipeline_mode = #tpu.pipeline_mode<synchronous>, transform_indices = @transform_20, window_bounds = array<i64: 64, 32>}, {pipeline_mode = #tpu.pipeline_mode<synchronous>, transform_indices = @transform_21, window_bounds = array<i64: 1, 32>}, {pipeline_mode = #tpu.pipeline_mode<synchronous>, transform_indices = @transform_22, window_bounds = array<i64: 1, 32>}, {pipeline_mode = #tpu.pipeline_mode<synchronous>, transform_indices = @transform_23, window_bounds = array<i64: 1, 32>}, {transform_indices = @transform_24, window_bounds = array<i64: 16, 32>}]} {
    %c0 = arith.constant 0 : index
    %c0_0 = arith.constant 0 : index
    %0 = vector.load %arg1[%c0, %c0_0] : memref<16x32xf32, #tpu.memory_space<vmem>>, vector<16x32xf32>
    %c0_1 = arith.constant 0 : index
    %c0_2 = arith.constant 0 : index
    %1 = vector.load %arg2[%c0_1, %c0_2] : memref<16x256xf32, #tpu.memory_space<vmem>>, vector<16x256xf32>
    %c0_3 = arith.constant 0 : index
    %c0_4 = arith.constant 0 : index
    %2 = vector.load %arg3[%c0_3, %c0_4] : memref<16x256xf32, #tpu.memory_space<vmem>>, vector<16x256xf32>
    %c0_5 = arith.constant 0 : index
    %c0_6 = arith.constant 0 : index
    %3 = vector.load %arg4[%c0_5, %c0_6] : memref<16x32xf32, #tpu.memory_space<vmem>>, vector<16x32xf32>
    %c0_7 = arith.constant 0 : index
    %c0_8 = arith.constant 0 : index
    %4 = vector.load %arg7[%c0_7, %c0_8] : memref<256x256xf32, #tpu.memory_space<vmem>>, vector<256x256xf32>
    %cst = arith.constant dense<0.000000e+00> : vector<16x256xf32>
    %5 = tpu.matmul %1, %4, %cst {dimension_numbers = #tpu.dot_dimension_numbers<[1], [0], [0], [1], [0, 0, 1, 1], [], []>} : vector<16x256xf32>, vector<256x256xf32>, vector<16x256xf32> -> vector<16x256xf32>
    %c0_9 = arith.constant 0 : index
    %c0_10 = arith.constant 0 : index
    %6 = vector.load %arg8[%c0_9, %c0_10] : memref<1x256xf32, #tpu.memory_space<vmem>>, vector<1x256xf32>
    %7 = vector.broadcast %6 : vector<1x256xf32> to vector<16x256xf32>
    %8 = arith.addf %5, %7 : vector<16x256xf32>
    %c0_11 = arith.constant 0 : index
    %c0_12 = arith.constant 0 : index
    %9 = vector.load %arg9[%c0_11, %c0_12] : memref<256x256xf32, #tpu.memory_space<vmem>>, vector<256x256xf32>
    %cst_13 = arith.constant dense<0.000000e+00> : vector<16x256xf32>
    %10 = tpu.matmul %2, %9, %cst_13 {dimension_numbers = #tpu.dot_dimension_numbers<[1], [0], [0], [1], [0, 0, 1, 1], [], []>} : vector<16x256xf32>, vector<256x256xf32>, vector<16x256xf32> -> vector<16x256xf32>
    %c0_14 = arith.constant 0 : index
    %c0_15 = arith.constant 0 : index
    %11 = vector.load %arg10[%c0_14, %c0_15] : memref<1x256xf32, #tpu.memory_space<vmem>>, vector<1x256xf32>
    %12 = vector.broadcast %11 : vector<1x256xf32> to vector<16x256xf32>
    %13 = arith.addf %10, %12 : vector<16x256xf32>
    %c0_16 = arith.constant 0 : index
    %c0_17 = arith.constant 0 : index
    %14 = vector.load %arg5[%c0_16, %c0_17] : memref<32x256xf32, #tpu.memory_space<vmem>>, vector<32x256xf32>
    %cst_18 = arith.constant dense<0.000000e+00> : vector<16x256xf32>
    %15 = tpu.matmul %0, %14, %cst_18 {dimension_numbers = #tpu.dot_dimension_numbers<[1], [0], [0], [1], [0, 0, 1, 1], [], []>} : vector<16x32xf32>, vector<32x256xf32>, vector<16x256xf32> -> vector<16x256xf32>
    %c0_19 = arith.constant 0 : index
    %c0_20 = arith.constant 0 : index
    %16 = vector.load %arg6[%c0_19, %c0_20] : memref<1x256xf32, #tpu.memory_space<vmem>>, vector<1x256xf32>
    %17 = vector.broadcast %16 : vector<1x256xf32> to vector<16x256xf32>
    %18 = arith.addf %15, %17 : vector<16x256xf32>
    %19 = arith.mulf %18, %8 : vector<16x256xf32>
    %c0_21 = arith.constant 0 : index
    %c0_22 = arith.constant 0 : index
    %20 = vector.load %arg11[%c0_21, %c0_22] : memref<256x32xf32, #tpu.memory_space<vmem>>, vector<256x32xf32>
    %cst_23 = arith.constant dense<0.000000e+00> : vector<16x32xf32>
    %21 = tpu.matmul %19, %20, %cst_23 {dimension_numbers = #tpu.dot_dimension_numbers<[1], [0], [0], [1], [0, 0, 1, 1], [], []>} : vector<16x256xf32>, vector<256x32xf32>, vector<16x32xf32> -> vector<16x32xf32>
    %cst_24 = arith.constant 0.000000e+00 : f32
    %22 = vector.broadcast %cst_24 : f32 to vector<16x32xf32>
    %23 = arith.cmpf oeq, %3, %22 : vector<16x32xf32>
    %cst_25 = arith.constant -1.000000e+09 : f32
    %24 = vector.broadcast %cst_25 : f32 to vector<16x32xf32>
    %25 = arith.select %23, %24, %21 : vector<16x32xi1>, vector<16x32xf32>
    %cst_26 = arith.constant dense<0xFF800000> : vector<16xf32>
    %26 = vector.multi_reduction <maximumf>, %25, %cst_26 [1] : vector<16x32xf32> to vector<16xf32>
    %27 = vector.shape_cast %26 : vector<16xf32> to vector<16x1xf32>
    %28 = vector.broadcast %27 : vector<16x1xf32> to vector<16x32xf32>
    %29 = arith.subf %25, %28 : vector<16x32xf32>
    %30 = math.exp %29 : vector<16x32xf32>
    %c0_27 = arith.constant 0 : index
    %c0_28 = arith.constant 0 : index
    %31 = vector.load %arg12[%c0_27, %c0_28] : memref<32x32xf32, #tpu.memory_space<vmem>>, vector<32x32xf32>
    %cst_29 = arith.constant dense<0.000000e+00> : vector<16x32xf32>
    %32 = tpu.matmul %30, %31, %cst_29 {dimension_numbers = #tpu.dot_dimension_numbers<[1], [0], [0], [1], [0, 0, 1, 1], [], []>} : vector<16x32xf32>, vector<32x32xf32>, vector<16x32xf32> -> vector<16x32xf32>
    %33 = arith.divf %30, %32 : vector<16x32xf32>
    %c0_30 = arith.constant 0 : index
    %c0_31 = arith.constant 0 : index
    %34 = vector.load %arg13[%c0_30, %c0_31] : memref<32x256xf32, #tpu.memory_space<vmem>>, vector<32x256xf32>
    %cst_32 = arith.constant dense<0.000000e+00> : vector<16x256xf32>
    %35 = tpu.matmul %33, %34, %cst_32 {dimension_numbers = #tpu.dot_dimension_numbers<[1], [0], [0], [1], [0, 0, 1, 1], [], []>} : vector<16x32xf32>, vector<32x256xf32>, vector<16x256xf32> -> vector<16x256xf32>
    %36 = arith.mulf %35, %13 : vector<16x256xf32>
    %c0_33 = arith.constant 0 : index
    %c0_34 = arith.constant 0 : index
    %37 = vector.load %arg14[%c0_33, %c0_34] : memref<256x32xf32, #tpu.memory_space<vmem>>, vector<256x32xf32>
    %cst_35 = arith.constant dense<0.000000e+00> : vector<16x32xf32>
    %38 = tpu.matmul %36, %37, %cst_35 {dimension_numbers = #tpu.dot_dimension_numbers<[1], [0], [0], [1], [0, 0, 1, 1], [], []>} : vector<16x256xf32>, vector<256x32xf32>, vector<16x32xf32> -> vector<16x32xf32>
    %c0_36 = arith.constant 0 : index
    %c0_37 = arith.constant 0 : index
    %39 = vector.load %arg15[%c0_36, %c0_37] : memref<32x32xf32, #tpu.memory_space<vmem>>, vector<32x32xf32>
    %cst_38 = arith.constant dense<0.000000e+00> : vector<16x32xf32>
    %40 = tpu.matmul %38, %39, %cst_38 {dimension_numbers = #tpu.dot_dimension_numbers<[1], [0], [0], [1], [0, 0, 1, 1], [], []>} : vector<16x32xf32>, vector<32x32xf32>, vector<16x32xf32> -> vector<16x32xf32>
    %c0_39 = arith.constant 0 : index
    %c0_40 = arith.constant 0 : index
    %41 = vector.load %arg16[%c0_39, %c0_40] : memref<1x32xf32, #tpu.memory_space<vmem>>, vector<1x32xf32>
    %42 = vector.broadcast %41 : vector<1x32xf32> to vector<16x32xf32>
    %43 = arith.addf %40, %42 : vector<16x32xf32>
    %44 = arith.addf %43, %0 : vector<16x32xf32>
    %c0_41 = arith.constant 0 : index
    %c0_42 = arith.constant 0 : index
    %45 = vector.load %arg17[%c0_41, %c0_42] : memref<1x32xf32, #tpu.memory_space<vmem>>, vector<1x32xf32>
    %c0_43 = arith.constant 0 : index
    %c0_44 = arith.constant 0 : index
    %46 = vector.load %arg18[%c0_43, %c0_44] : memref<1x32xf32, #tpu.memory_space<vmem>>, vector<1x32xf32>
    %cst_45 = arith.constant dense<0.000000e+00> : vector<16xf32>
    %47 = vector.multi_reduction <add>, %44, %cst_45 [1] : vector<16x32xf32> to vector<16xf32>
    %48 = vector.shape_cast %47 : vector<16xf32> to vector<16x1xf32>
    %cst_46 = arith.constant 3.200000e+01 : f32
    %49 = vector.broadcast %cst_46 : f32 to vector<16x1xf32>
    %50 = arith.divf %48, %49 : vector<16x1xf32>
    %51 = vector.broadcast %50 : vector<16x1xf32> to vector<16x32xf32>
    %52 = arith.subf %44, %51 : vector<16x32xf32>
    %53 = arith.mulf %52, %52 : vector<16x32xf32>
    %cst_47 = arith.constant dense<0.000000e+00> : vector<16xf32>
    %54 = vector.multi_reduction <add>, %53, %cst_47 [1] : vector<16x32xf32> to vector<16xf32>
    %55 = vector.shape_cast %54 : vector<16xf32> to vector<16x1xf32>
    %cst_48 = arith.constant 3.200000e+01 : f32
    %56 = vector.broadcast %cst_48 : f32 to vector<16x1xf32>
    %57 = arith.divf %55, %56 : vector<16x1xf32>
    %58 = vector.broadcast %50 : vector<16x1xf32> to vector<16x32xf32>
    %59 = arith.subf %44, %58 : vector<16x32xf32>
    %cst_49 = arith.constant 9.99999974E-6 : f32
    %60 = vector.broadcast %cst_49 : f32 to vector<16x1xf32>
    %61 = arith.addf %57, %60 : vector<16x1xf32>
    %62 = math.rsqrt %61 : vector<16x1xf32>
    %63 = vector.broadcast %62 : vector<16x1xf32> to vector<16x32xf32>
    %64 = arith.mulf %59, %63 : vector<16x32xf32>
    %65 = vector.broadcast %45 : vector<1x32xf32> to vector<16x32xf32>
    %66 = arith.mulf %64, %65 : vector<16x32xf32>
    %67 = vector.broadcast %46 : vector<1x32xf32> to vector<16x32xf32>
    %68 = arith.addf %66, %67 : vector<16x32xf32>
    %c0_50 = arith.constant 0 : index
    %c0_51 = arith.constant 0 : index
    %69 = vector.load %arg19[%c0_50, %c0_51] : memref<32x64xf32, #tpu.memory_space<vmem>>, vector<32x64xf32>
    %cst_52 = arith.constant dense<0.000000e+00> : vector<16x64xf32>
    %70 = tpu.matmul %68, %69, %cst_52 {dimension_numbers = #tpu.dot_dimension_numbers<[1], [0], [0], [1], [0, 0, 1, 1], [], []>} : vector<16x32xf32>, vector<32x64xf32>, vector<16x64xf32> -> vector<16x64xf32>
    %c0_53 = arith.constant 0 : index
    %c0_54 = arith.constant 0 : index
    %71 = vector.load %arg20[%c0_53, %c0_54] : memref<1x64xf32, #tpu.memory_space<vmem>>, vector<1x64xf32>
    %72 = vector.broadcast %71 : vector<1x64xf32> to vector<16x64xf32>
    %73 = arith.addf %70, %72 : vector<16x64xf32>
    %cst_55 = arith.constant 0.000000e+00 : f32
    %74 = vector.broadcast %cst_55 : f32 to vector<16x64xf32>
    %75 = arith.maximumf %73, %74 : vector<16x64xf32>
    %c0_56 = arith.constant 0 : index
    %c0_57 = arith.constant 0 : index
    %76 = vector.load %arg21[%c0_56, %c0_57] : memref<64x32xf32, #tpu.memory_space<vmem>>, vector<64x32xf32>
    %cst_58 = arith.constant dense<0.000000e+00> : vector<16x32xf32>
    %77 = tpu.matmul %75, %76, %cst_58 {dimension_numbers = #tpu.dot_dimension_numbers<[1], [0], [0], [1], [0, 0, 1, 1], [], []>} : vector<16x64xf32>, vector<64x32xf32>, vector<16x32xf32> -> vector<16x32xf32>
    %c0_59 = arith.constant 0 : index
    %c0_60 = arith.constant 0 : index
    %78 = vector.load %arg22[%c0_59, %c0_60] : memref<1x32xf32, #tpu.memory_space<vmem>>, vector<1x32xf32>
    %79 = vector.broadcast %78 : vector<1x32xf32> to vector<16x32xf32>
    %80 = arith.addf %77, %79 : vector<16x32xf32>
    %81 = arith.addf %80, %68 : vector<16x32xf32>
    %c0_61 = arith.constant 0 : index
    %c0_62 = arith.constant 0 : index
    %82 = vector.load %arg23[%c0_61, %c0_62] : memref<1x32xf32, #tpu.memory_space<vmem>>, vector<1x32xf32>
    %c0_63 = arith.constant 0 : index
    %c0_64 = arith.constant 0 : index
    %83 = vector.load %arg24[%c0_63, %c0_64] : memref<1x32xf32, #tpu.memory_space<vmem>>, vector<1x32xf32>
    %cst_65 = arith.constant dense<0.000000e+00> : vector<16xf32>
    %84 = vector.multi_reduction <add>, %81, %cst_65 [1] : vector<16x32xf32> to vector<16xf32>
    %85 = vector.shape_cast %84 : vector<16xf32> to vector<16x1xf32>
    %cst_66 = arith.constant 3.200000e+01 : f32
    %86 = vector.broadcast %cst_66 : f32 to vector<16x1xf32>
    %87 = arith.divf %85, %86 : vector<16x1xf32>
    %88 = vector.broadcast %87 : vector<16x1xf32> to vector<16x32xf32>
    %89 = arith.subf %81, %88 : vector<16x32xf32>
    %90 = arith.mulf %89, %89 : vector<16x32xf32>
    %cst_67 = arith.constant dense<0.000000e+00> : vector<16xf32>
    %91 = vector.multi_reduction <add>, %90, %cst_67 [1] : vector<16x32xf32> to vector<16xf32>
    %92 = vector.shape_cast %91 : vector<16xf32> to vector<16x1xf32>
    %cst_68 = arith.constant 3.200000e+01 : f32
    %93 = vector.broadcast %cst_68 : f32 to vector<16x1xf32>
    %94 = arith.divf %92, %93 : vector<16x1xf32>
    %95 = vector.broadcast %87 : vector<16x1xf32> to vector<16x32xf32>
    %96 = arith.subf %81, %95 : vector<16x32xf32>
    %cst_69 = arith.constant 9.99999974E-6 : f32
    %97 = vector.broadcast %cst_69 : f32 to vector<16x1xf32>
    %98 = arith.addf %94, %97 : vector<16x1xf32>
    %99 = math.rsqrt %98 : vector<16x1xf32>
    %100 = vector.broadcast %99 : vector<16x1xf32> to vector<16x32xf32>
    %101 = arith.mulf %96, %100 : vector<16x32xf32>
    %102 = vector.broadcast %82 : vector<1x32xf32> to vector<16x32xf32>
    %103 = arith.mulf %101, %102 : vector<16x32xf32>
    %104 = vector.broadcast %83 : vector<1x32xf32> to vector<16x32xf32>
    %105 = arith.addf %103, %104 : vector<16x32xf32>
    %c0_70 = arith.constant 0 : index
    %c0_71 = arith.constant 0 : index
    %106 = vector.load %arg25[%c0_70, %c0_71] : memref<16x32xf32, #tpu.memory_space<vmem>>, vector<16x32xf32>
    tpu.vector_store %arg25[%c0_70, %c0_71], %105 {strides = array<i32>} : memref<16x32xf32, #tpu.memory_space<vmem>>, vector<16x32xf32>,
    return
  }
  func.func @transform_0(%arg0: i32) -> (i32, i32) {
    %c0_i32 = arith.constant 0 : i32
    %c0_i32_0 = arith.constant 0 : i32
    return %arg0, %c0_i32 : i32, i32
  }
  func.func @transform_1(%arg0: i32) -> (i32, i32) {
    %c0_i32 = arith.constant 0 : i32
    %c0_i32_0 = arith.constant 0 : i32
    return %arg0, %c0_i32 : i32, i32
  }
  func.func @transform_2(%arg0: i32) -> (i32, i32) {
    %c0_i32 = arith.constant 0 : i32
    %c0_i32_0 = arith.constant 0 : i32
    return %arg0, %c0_i32 : i32, i32
  }
  func.func @transform_3(%arg0: i32) -> (i32, i32) {
    %c0_i32 = arith.constant 0 : i32
    %c0_i32_0 = arith.constant 0 : i32
    return %arg0, %c0_i32 : i32, i32
  }
  func.func @transform_4(%arg0: i32) -> (i32, i32) {
    %c0_i32 = arith.constant 0 : i32
    %c0_i32_0 = arith.constant 0 : i32
    %c0_i32_1 = arith.constant 0 : i32
    return %c0_i32, %c0_i32_0 : i32, i32
  }
  func.func @transform_5(%arg0: i32) -> (i32, i32) {
    %c0_i32 = arith.constant 0 : i32
    %c0_i32_0 = arith.constant 0 : i32
    %c0_i32_1 = arith.constant 0 : i32
    return %c0_i32, %c0_i32_0 : i32, i32
  }
  func.func @transform_6(%arg0: i32) -> (i32, i32) {
    %c0_i32 = arith.constant 0 : i32
    %c0_i32_0 = arith.constant 0 : i32
    %c0_i32_1 = arith.constant 0 : i32
    return %c0_i32, %c0_i32_0 : i32, i32
  }
  func.func @transform_7(%arg0: i32) -> (i32, i32) {
    %c0_i32 = arith.constant 0 : i32
    %c0_i32_0 = arith.constant 0 : i32
    %c0_i32_1 = arith.constant 0 : i32
    return %c0_i32, %c0_i32_0 : i32, i32
  }
  func.func @transform_8(%arg0: i32) -> (i32, i32) {
    %c0_i32 = arith.constant 0 : i32
    %c0_i32_0 = arith.constant 0 : i32
    %c0_i32_1 = arith.constant 0 : i32
    return %c0_i32, %c0_i32_0 : i32, i32
  }
  func.func @transform_9(%arg0: i32) -> (i32, i32) {
    %c0_i32 = arith.constant 0 : i32
    %c0_i32_0 = arith.constant 0 : i32
    %c0_i32_1 = arith.constant 0 : i32
    return %c0_i32, %c0_i32_0 : i32, i32
  }
  func.func @transform_10(%arg0: i32) -> (i32, i32) {
    %c0_i32 = arith.constant 0 : i32
    %c0_i32_0 = arith.constant 0 : i32
    %c0_i32_1 = arith.constant 0 : i32
    return %c0_i32, %c0_i32_0 : i32, i32
  }
  func.func @transform_11(%arg0: i32) -> (i32, i32) {
    %c0_i32 = arith.constant 0 : i32
    %c0_i32_0 = arith.constant 0 : i32
    %c0_i32_1 = arith.constant 0 : i32
    return %c0_i32, %c0_i32_0 : i32, i32
  }
  func.func @transform_12(%arg0: i32) -> (i32, i32) {
    %c0_i32 = arith.constant 0 : i32
    %c0_i32_0 = arith.constant 0 : i32
    %c0_i32_1 = arith.constant 0 : i32
    return %c0_i32, %c0_i32_0 : i32, i32
  }
  func.func @transform_13(%arg0: i32) -> (i32, i32) {
    %c0_i32 = arith.constant 0 : i32
    %c0_i32_0 = arith.constant 0 : i32
    %c0_i32_1 = arith.constant 0 : i32
    return %c0_i32, %c0_i32_0 : i32, i32
  }
  func.func @transform_14(%arg0: i32) -> (i32, i32) {
    %c0_i32 = arith.constant 0 : i32
    %c0_i32_0 = arith.constant 0 : i32
    %c0_i32_1 = arith.constant 0 : i32
    return %c0_i32, %c0_i32_0 : i32, i32
  }
  func.func @transform_15(%arg0: i32) -> (i32, i32) {
    %c0_i32 = arith.constant 0 : i32
    %c0_i32_0 = arith.constant 0 : i32
    %c0_i32_1 = arith.constant 0 : i32
    return %c0_i32, %c0_i32_0 : i32, i32
  }
  func.func @transform_16(%arg0: i32) -> (i32, i32) {
    %c0_i32 = arith.constant 0 : i32
    %c0_i32_0 = arith.constant 0 : i32
    %c0_i32_1 = arith.constant 0 : i32
    return %c0_i32, %c0_i32_0 : i32, i32
  }
  func.func @transform_17(%arg0: i32) -> (i32, i32) {
    %c0_i32 = arith.constant 0 : i32
    %c0_i32_0 = arith.constant 0 : i32
    %c0_i32_1 = arith.constant 0 : i32
    return %c0_i32, %c0_i32_0 : i32, i32
  }
  func.func @transform_18(%arg0: i32) -> (i32, i32) {
    %c0_i32 = arith.constant 0 : i32
    %c0_i32_0 = arith.constant 0 : i32
    %c0_i32_1 = arith.constant 0 : i32
    return %c0_i32, %c0_i32_0 : i32, i32
  }
  func.func @transform_19(%arg0: i32) -> (i32, i32) {
    %c0_i32 = arith.constant 0 : i32
    %c0_i32_0 = arith.constant 0 : i32
    %c0_i32_1 = arith.constant 0 : i32
    return %c0_i32, %c0_i32_0 : i32, i32
  }
  func.func @transform_20(%arg0: i32) -> (i32, i32) {
    %c0_i32 = arith.constant 0 : i32
    %c0_i32_0 = arith.constant 0 : i32
    %c0_i32_1 = arith.constant 0 : i32
    return %c0_i32, %c0_i32_0 : i32, i32
  }
  func.func @transform_21(%arg0: i32) -> (i32, i32) {
    %c0_i32 = arith.constant 0 : i32
    %c0_i32_0 = arith.constant 0 : i32
    %c0_i32_1 = arith.constant 0 : i32
    return %c0_i32, %c0_i32_0 : i32, i32
  }
  func.func @transform_22(%arg0: i32) -> (i32, i32) {
    %c0_i32 = arith.constant 0 : i32
    %c0_i32_0 = arith.constant 0 : i32
    %c0_i32_1 = arith.constant 0 : i32
    return %c0_i32, %c0_i32_0 : i32, i32
  }
  func.func @transform_23(%arg0: i32) -> (i32, i32) {
    %c0_i32 = arith.constant 0 : i32
    %c0_i32_0 = arith.constant 0 : i32
    %c0_i32_1 = arith.constant 0 : i32
    return %c0_i32, %c0_i32_0 : i32, i32
  }
  func.func @transform_24(%arg0: i32) -> (i32, i32) {
    %c0_i32 = arith.constant 0 : i32
    %c0_i32_0 = arith.constant 0 : i32
    return %arg0, %c0_i32 : i32, i32
  }
}

</mosaic_0001>

<bundles_post_ra>
// kernel: tpu_custom_call.1
= control target key start
LH: loop header
LB: loop body
LE: loop exit
PB: predicated region body
PF: predicated region fallthrough
CT: control target
= control target key end

     0   :  { %s4061_s0 = inlined_call_operand.vmem [shape: f32[64,32], index: 0, kind: input, shape index: {}]   ;;  %s4062_s1 = inlined_call_operand.vmem [shape: f32[64,256], index: 1, kind: input, shape index: {}]   ;;  %s4063_s2 = inlined_call_operand.vmem [shape: f32[64,256], index: 2, kind: input, shape index: {}]   ;;  %s4064_s3 = inlined_call_operand.vmem [shape: f32[64,32], index: 3, kind: input, shape index: {}]   ;;  %s4065_s4 = inlined_call_operand.hbm [shape: f32[32,256], index: 4, kind: input, shape index: {}]   ;;  %s4066_s5 = inlined_call_operand.vmem [shape: f32[1,256], index: 5, kind: input, shape index: {}]   ;;  %s4067_s6 = inlined_call_operand.vmem [shape: f32[256,256], index: 6, kind: input, shape index: {}]   ;;  %s4068_s7 = inlined_call_operand.hbm [shape: f32[1,256], index: 7, kind: input, shape index: {}]   ;;  %s4069_s8 = inlined_call_operand.hbm [shape: f32[256,256], index: 8, kind: input, shape index: {}]   ;;  %s4070_s9 = inlined_call_operand.hbm [shape: f32[1,256], index: 9, kind: input, shape index: {}]   ;;  %s4071_s10 = inlined_call_operand.vmem [shape: f32[256,32], index: 10, kind: input, shape index: {}]   ;;  %s4072_s11 = inlined_call_operand.hbm [shape: f32[32,32], index: 11, kind: input, shape index: {}]   ;;  %s4073_s12 = inlined_call_operand.vmem [shape: f32[32,256], index: 12, kind: input, shape index: {}]   ;;  %s4074_s13 = inlined_call_operand.vmem [shape: f32[256,32], index: 13, kind: input, shape index: {}]   ;;  %s4075_s14 = inlined_call_operand.hbm [shape: f32[32,32], index: 14, kind: input, shape index: {}]   ;;  %s4076_s15 = inlined_call_operand.vmem [shape: f32[1,32], index: 15, kind: input, shape index: {}]   ;;  %s4077_s16 = inlined_call_operand.vmem [shape: f32[1,32], index: 16, kind: input, shape index: {}]   ;;  %s4078_s17 = inlined_call_operand.hbm [shape: f32[1,32], index: 17, kind: input, shape index: {}]   ;;  %s4079_s18 = inlined_call_operand.vmem [shape: f32[32,64], index: 18, kind: input, shape index: {}]   ;;  %s4080_s19 = inlined_call_operand.hbm [shape: f32[1,64], index: 19, kind: input, shape index: {}]   ;;  %s4081_s20 = inlined_call_operand.vmem [shape: f32[64,32], index: 20, kind: input, shape index: {}]   ;;  %s4082_s21 = inlined_call_operand.vmem [shape: f32[1,32], index: 21, kind: input, shape index: {}]   ;;  %s4083_s22 = inlined_call_operand.vmem [shape: f32[1,32], index: 22, kind: input, shape index: {}]   ;;  %s4084_s23 = inlined_call_operand.vmem [shape: f32[1,32], index: 23, kind: input, shape index: {}]   ;;  %s4085_s24 = inlined_call_operand.vmem [shape: f32[64,32], index: 24, kind: output, shape index: {}]  }
   0x1   :  { %4098 = sst [smem:[#allocation20_spill]] %s4061_s0 }
   0x2   :  { %4099 = sst [smem:[#allocation21_spill]] %s4062_s1 }
   0x3   :  { %4100 = sst [smem:[#allocation22_spill]] %s4063_s2 }
   0x4   :  { %4101 = sst [smem:[#allocation23_spill]] %s4064_s3 }
   0x5   :  { %4102 = sst [smem:[#allocation24_spill]] %s4065_s4 }
   0x6   :  { %4103 = sst [smem:[#allocation25_spill]] %s4066_s5 }
   0x7   :  { %4104 = sst [smem:[#allocation26_spill]] %s4067_s6 }
   0x8   :  { %4105 = sst [smem:[#allocation27_spill]] %s4068_s7 }
   0x9   :  { %4106 = sst [smem:[#allocation28_spill]] %s4069_s8 }
   0xa   :  { %4107 = sst [smem:[#allocation29_spill]] %s4070_s9 }
   0xb   :  { %4108 = sst [smem:[#allocation30_spill]] %s4075_s14 }
   0xc   :  { %4109 = sst [smem:[#allocation31_spill]] %s4077_s16 }
   0xd   :  { %4110 = sst [smem:[#allocation32_spill]] %s4081_s20 }
   0xe   :  { %4111 = sst [smem:[#allocation33_spill]] %s4082_s21 }
   0xf   :  { %4112 = sst [smem:[#allocation34_spill]] %s4083_s22 }
  0x10   :  { %4113 = sst [smem:[#allocation35_spill]] %s4084_s23 }
  0x11   :  { %4114 = sst [smem:[#allocation36_spill]] %s4085_s24 }
  0x12   :  { %29 = vsyncpa [#allocation3], 0 }
  0x13   :  { %30 = vsyncpa [#allocation5], 0 }
  0x14   :  { %31 = vsyncpa [#allocation8], 0 }
  0x15   :  { %32 = vsyncpa [#allocation11], 0 }
  0x16   :  { %33 = vsyncpa [#allocation14], 0  ;;  %s3271_s5 = smov 0  }
  0x17 LB: > { %s3133_s26 = smov [#allocation4]   ;;  %s4090_s28 = sadd.s32 4294967295, %s3131_s5   ;;  %s3131_s5 = sphi %s3271_s5, %s39_s5  }
  0x18   : > { %s626_s27 = sshll.u32 %s3133_s26, 4  ;;  %p2313_p0 = scmp.ge.s32.totalorder %s3131_s5, 1  ;;  %s3285_s27 = int_to_ptr.vmem [resolvable:$true] %s626_s27 }
  0x19   : > { %p594_p1 = scmp.lt.s32.totalorder %s3131_s5, 5  ;;  %p3281_p2 = scmp.eq.s32.totalorder %s4090_s28, 0 }
  0x1a   : > { %s3134_s29 = smov [#allocation7]   ;;  %s3135_s30 = smov [#allocation10]  }
  0x1b   : > { %s4115_s6 = scalar_select %p3281_p2, 1, 0 }
  0x1c   : > { %p3287_p3 = pnand %p2313_p0, %p594_p1  ;;  %s650_s0 = sshll.u32 %s3134_s29, 4  ;;  %s3293_s0 = int_to_ptr.vmem [resolvable:$true] %s650_s0 }
  0x1d   : > { %s682_s3 = sshll.u32 %s3135_s30, 4  ;;  %s3136_s25 = smov [#allocation2]   ;;  %s3301_s3 = int_to_ptr.vmem [resolvable:$true] %s682_s3 }
  0x1e   : > { %s4116_s2 = scalar_select %p3287_p3, 1, 0 }
  0x1f   : > { %p2803_p4 = pneg %p3287_p3  ;;  %s3303_s8 = sshll.u32 %s3136_s25, 4  ;;  %s607_s8 = int_to_ptr.vmem [resolvable:$true] %s3303_s8 }
  0x20   : > { %s4118_s26 = sld [smem:[#allocation27_spill]] }
  0x21   : > { %p3297_p5 = pnand %p3281_p2, %p2803_p4 }
  0x23   : > { %p3313_p7 = pneg %p3297_p5 }
  0x26   : > { %s2881_s29 = scalar_lea.hbm %s4118_s26, 32 }
  0x27   : > { %p2882_p6 = scmp.ne.s32.totalorder %s4118_s26, %s2881_s29  ;;  %p2888_p10 = scmp.lt.u32.totalorder %s2881_s29, %s4118_s26 }
  0x29   : > { %p2884_p8 = pnand %p3313_p7, %p2882_p6 }
  0x2b   : > { %p2885_p9 = pneg %p2884_p8 }
  0x2d   : > { %p2890_p11 = pnand %p2888_p10, %p2885_p9 }
  0x2f   : > { %2893 = shalt.err (!%p2890_p11)
}
  0x30   : > { %s2894_s24 = scalar_lea.vmem %s3285_s27, 32  ;;  %p2902_p1 = scmp.lt.s32.totalorder %s3285_s27, %s3285_s27 }
  0x31   : > { %p2895_p12 = scmp.ne.s32.totalorder %s3285_s27, %s2894_s24  ;;  %p2903_p4 = scmp.lt.s32.totalorder %s2894_s24, %s2894_s24 }
  0x33   : > { %p2897_p13 = pnand %p2895_p12, %p3313_p7  ;;  %p2904_p6 = por %p2903_p4, %p2902_p1 }
  0x35   : > { %p2898_p0 = pneg %p2897_p13 }
  0x37   : > { %p2905_p8 = pnand %p2904_p6, %p2898_p0 }
  0x39   : > { %2908 = shalt.err (!%p2905_p8)
}
  0x3a   : > { %2809 = dma.hbm_to_vmem [thread:$0]  (!%p3297_p5), %s4118_s26, 32, %s3285_s27, [#allocation5]  }
  0x3b   : > { %s4120_s9 = sld [smem:[#allocation29_spill]] }
  0x41   : > { %s2909_s30 = scalar_lea.hbm %s4120_s9, 32 }
  0x42   : > { %p2910_p9 = scmp.ne.s32.totalorder %s4120_s9, %s2909_s30  ;;  %p2916_p12 = scmp.lt.u32.totalorder %s2909_s30, %s4120_s9 }
  0x44   : > { %p2912_p10 = pnand %p2910_p9, %p3313_p7 }
  0x46   : > { %p2913_p11 = pneg %p2912_p10 }
  0x48   : > { %p2918_p13 = pnand %p2916_p12, %p2913_p11 }
  0x4a   : > { %2921 = shalt.err (!%p2918_p13)
}
  0x4b   : > { %s2922_s27 = scalar_lea.vmem %s3293_s0, 32  ;;  %p2930_p6 = scmp.lt.s32.totalorder %s3293_s0, %s3293_s0 }
  0x4c   : > { %p2923_p0 = scmp.ne.s32.totalorder %s3293_s0, %s2922_s27  ;;  %p2931_p8 = scmp.lt.s32.totalorder %s2922_s27, %s2922_s27 }
  0x4e   : > { %p2925_p1 = pnand %p2923_p0, %p3313_p7  ;;  %p2932_p9 = por %p2931_p8, %p2930_p6 }
  0x50   : > { %p2926_p4 = pneg %p2925_p1 }
  0x52   : > { %p2933_p10 = pnand %p2932_p9, %p2926_p4 }
  0x54   : > { %2936 = shalt.err (!%p2933_p10)
}
  0x55   : > { %2815 = dma.hbm_to_vmem [thread:$0]  (!%p3297_p5), %s4120_s9, 32, %s3293_s0, [#allocation8]  }
  0x56   : > { %s4121_s14 = sld [smem:[#allocation30_spill]] }
  0x5c   : > { %s2937_s1 = scalar_lea.hbm %s4121_s14, 512 }
  0x5d   : > { %p2938_p11 = scmp.ne.s32.totalorder %s4121_s14, %s2937_s1  ;;  %p2944_p0 = scmp.lt.u32.totalorder %s2937_s1, %s4121_s14 }
  0x5f   : > { %p2940_p12 = pnand %p2938_p11, %p3313_p7 }
  0x61   : > { %p2941_p13 = pneg %p2940_p12 }
  0x63   : > { %p2946_p1 = pnand %p2944_p0, %p2941_p13 }
  0x65   : > { %2949 = shalt.err (!%p2946_p1)
}
  0x66   : > { %s2950_s0 = scalar_lea.vmem %s3301_s3, 512  ;;  %p2958_p9 = scmp.lt.s32.totalorder %s3301_s3, %s3301_s3 }
  0x67   : > { %p2951_p4 = scmp.ne.s32.totalorder %s3301_s3, %s2950_s0  ;;  %p2959_p10 = scmp.lt.s32.totalorder %s2950_s0, %s2950_s0 }
  0x69   : > { %p2953_p6 = pnand %p2951_p4, %p3313_p7  ;;  %p2960_p11 = por %p2959_p10, %p2958_p9 }
  0x6b   : > { %p2954_p8 = pneg %p2953_p6 }
  0x6d   : > { %p2961_p12 = pnand %p2960_p11, %p2954_p8 }
  0x6f   : > { %2964 = shalt.err (!%p2961_p12)
}
  0x70   : > { %s4094_s27 = smov 128   ;;  %s4095_s21 = smov 8  }
  0x71   : > { %2821 = dma.hbm_to_vmem [thread:$0]  (!%p3297_p5), %s4121_s14, 512, %s3301_s3, [#allocation11], %s4094_s27, %s4094_s27, %s4095_s21  }
  0x72   : > { %s4122_s29 = sld [smem:[#allocation24_spill]] }
  0x78   : > { %s2965_s30 = scalar_lea.hbm %s4122_s29, 1024 }
  0x79   : > { %p2966_p13 = scmp.ne.s32.totalorder %s4122_s29, %s2965_s30  ;;  %p2972_p4 = scmp.lt.u32.totalorder %s2965_s30, %s4122_s29 }
  0x7b   : > { %p2968_p0 = pnand %p2966_p13, %p3313_p7 }
  0x7d   : > { %p2969_p1 = pneg %p2968_p0 }
  0x7f   : > { %p2974_p6 = pnand %p2972_p4, %p2969_p1 }
  0x81   : > { %2977 = shalt.err (!%p2974_p6)
}
  0x82   : > { %s2978_s22 = scalar_lea.vmem %s607_s8, 1024  ;;  %p2986_p11 = scmp.lt.s32.totalorder %s607_s8, %s607_s8 }
  0x83   : > { %p2979_p8 = scmp.ne.s32.totalorder %s607_s8, %s2978_s22  ;;  %p2987_p12 = scmp.lt.s32.totalorder %s2978_s22, %s2978_s22 }
  0x85   : > { %p2981_p9 = pnand %p2979_p8, %p3313_p7  ;;  %p2988_p2 = por %p2987_p12, %p2986_p11 }
  0x87   : > { %p2982_p10 = pneg %p2981_p9 }
  0x89   : > { %p2989_p3 = pnand %p2988_p2, %p2982_p10 }
  0x8b   : > { %2992 = shalt.err (!%p2989_p3)
}
  0x8c   : > { %s3139_s3 = smov 256   ;;  %s3140_s28 = smov 16  }
  0x8d   : > { %2806 = dma.hbm_to_vmem [thread:$0]  (!%p3297_p5), %s4122_s29, 1024, %s607_s8, [#allocation3], %s3139_s3, %s3139_s3, %s3140_s28  }
  0x8e   : > { %s3141_s1 = smov [#allocation6]   ;;  %s3142_s25 = smov [#allocation9]  }
  0x8f   : > { %s636_s30 = sshll.u32 %s3141_s1, 4  ;;  %s663_s24 = sshll.u32 %s3142_s25, 4  ;;  %s637_s30 = int_to_ptr.vmem [resolvable:$true] %s636_s30  ;;  %s664_s24 = int_to_ptr.vmem [resolvable:$true] %s663_s24 }
  0x90   : > { %s4123_s22 = sld [smem:[#allocation28_spill]] }
  0x96   : > { %s2993_s21 = scalar_lea.hbm %s4123_s22, 8192 }
  0x97   : > { %p2994_p2 = scmp.ne.s32.totalorder %s4123_s22, %s2993_s21  ;;  %p3000_p0 = scmp.lt.u32.totalorder %s2993_s21, %s4123_s22 }
  0x99   : > { %p2996_p3 = pnand %p2994_p2, %p3313_p7 }
  0x9b   : > { %p2997_p13 = pneg %p2996_p3 }
  0x9d   : > { %p3002_p1 = pnand %p3000_p0, %p2997_p13 }
  0x9f   : > { %3005 = shalt.err (!%p3002_p1)
}
  0xa0   : > { %s3006_s8 = scalar_lea.vmem %s637_s30, 8192  ;;  %p3014_p9 = scmp.lt.s32.totalorder %s637_s30, %s637_s30 }
  0xa1   : > { %p3007_p4 = scmp.ne.s32.totalorder %s637_s30, %s3006_s8  ;;  %p3015_p10 = scmp.lt.s32.totalorder %s3006_s8, %s3006_s8 }
  0xa3   : > { %p3009_p6 = pnand %p3007_p4, %p3313_p7  ;;  %p3016_p11 = por %p3015_p10, %p3014_p9 }
  0xa5   : > { %p3010_p8 = pneg %p3009_p6 }
  0xa7   : > { %p3017_p12 = pnand %p3016_p11, %p3010_p8 }
  0xa9   : > { %3020 = shalt.err (!%p3017_p12)
}
  0xaa   : > { %2812 = dma.hbm_to_vmem [thread:$0]  (!%p3297_p5), %s4123_s22, 8192, %s637_s30, [#allocation5], %s3139_s3, %s3139_s3, %s3140_s28  }
  0xab   : > { %s3021_s27 = scalar_lea.hbm %s4072_s11, 512 }
  0xac   : > { %p3022_p2 = scmp.ne.s32.totalorder %s4072_s11, %s3021_s27  ;;  %p3028_p0 = scmp.lt.u32.totalorder %s3021_s27, %s4072_s11 }
  0xae   : > { %p3024_p3 = pnand %p3022_p2, %p3313_p7 }
  0xb0   : > { %p3025_p13 = pneg %p3024_p3 }
  0xb2   : > { %p3030_p1 = pnand %p3028_p0, %p3025_p13 }
  0xb4   : > { %3033 = shalt.err (!%p3030_p1)
}
  0xb5   : > { %s3034_s25 = scalar_lea.vmem %s664_s24, 512  ;;  %p3042_p9 = scmp.lt.s32.totalorder %s664_s24, %s664_s24 }
  0xb6   : > { %p3035_p4 = scmp.ne.s32.totalorder %s664_s24, %s3034_s25  ;;  %p3043_p10 = scmp.lt.s32.totalorder %s3034_s25, %s3034_s25 }
  0xb8   : > { %p3037_p6 = pnand %p3035_p4, %p3313_p7  ;;  %p3044_p11 = por %p3043_p10, %p3042_p9 }
  0xba   : > { %p3038_p8 = pneg %p3037_p6 }
  0xbc   : > { %p3045_p12 = pnand %p3044_p11, %p3038_p8 }
  0xbe   : > { %3048 = shalt.err (!%p3045_p12)
}
  0xbf   : > { %s4124_s3 = smov 8   ;;  %s4125_s28 = smov 128  }
  0xc0   : > { %2818 = dma.hbm_to_vmem [thread:$0]  (!%p3297_p5), %s4072_s11, 512, %s664_s24, [#allocation8], %s4125_s28, %s4125_s28, %s4124_s3  }
  0xc1   : > { %s3143_s8 = smov [#allocation12]   ;;  %s3144_s26 = smov [#allocation13]  }
  0xc2   : > { %s702_s14 = sshll.u32 %s3143_s8, 4  ;;  %s716_s16 = sshll.u32 %s3144_s26, 4  ;;  %s703_s14 = int_to_ptr.vmem [resolvable:$true] %s702_s14  ;;  %s717_s16 = int_to_ptr.vmem [resolvable:$true] %s716_s16 }
  0xc3   : > { %s3049_s21 = scalar_lea.hbm %s4078_s17, 16 }
  0xc4   : > { %p3050_p2 = scmp.ne.s32.totalorder %s4078_s17, %s3049_s21  ;;  %p3056_p0 = scmp.lt.u32.totalorder %s3049_s21, %s4078_s17 }
  0xc6   : > { %p3052_p3 = pnand %p3050_p2, %p3313_p7 }
  0xc8   : > { %p3053_p13 = pneg %p3052_p3 }
  0xca   : > { %p3058_p1 = pnand %p3056_p0, %p3053_p13 }
  0xcc   : > { %3061 = shalt.err (!%p3058_p1)
}
  0xcd   : > { %s3062_s24 = scalar_lea.vmem %s703_s14, 16  ;;  %s3069_s3 = scalar_lea.vmem %s703_s14, 32 }
  0xce   : > { %p3063_p4 = scmp.ne.s32.totalorder %s703_s14, %s3062_s24  ;;  %p3070_p9 = scmp.lt.s32.totalorder %s703_s14, %s703_s14 }
  0xcf   : > { %p3071_p10 = scmp.lt.s32.totalorder %s3069_s3, %s3062_s24 }
  0xd0   : > { %p3065_p6 = pnand %p3063_p4, %p3313_p7 }
  0xd1   : > { %p3072_p11 = por %p3071_p10, %p3070_p9 }
  0xd2   : > { %p3066_p8 = pneg %p3065_p6 }
  0xd4   : > { %p3073_p12 = pnand %p3072_p11, %p3066_p8 }
  0xd6   : > { %3076 = shalt.err (!%p3073_p12)
}
  0xd7   : > { %2824 = dma.hbm_to_vmem [thread:$0]  (!%p3297_p5), %s4078_s17, 16, %s703_s14, [#allocation11]  }
  0xd8   : > { %s3077_s26 = scalar_lea.hbm %s4080_s19, 16 }
  0xd9   : > { %p3078_p2 = scmp.ne.s32.totalorder %s4080_s19, %s3077_s26  ;;  %p3084_p0 = scmp.lt.u32.totalorder %s3077_s26, %s4080_s19 }
  0xdb   : > { %p3080_p3 = pnand %p3078_p2, %p3313_p7 }
  0xdd   : > { %p3081_p13 = pneg %p3080_p3 }
  0xdf   : > { %p3086_p1 = pnand %p3084_p0, %p3081_p13 }
  0xe1   : > { %3089 = shalt.err (!%p3086_p1)
}
  0xe2   : > { %s3090_s4 = scalar_lea.vmem %s717_s16, 16  ;;  %s3097_s14 = scalar_lea.vmem %s717_s16, 32 }
  0xe3   : > { %p3091_p4 = scmp.ne.s32.totalorder %s717_s16, %s3090_s4  ;;  %p3098_p9 = scmp.lt.s32.totalorder %s717_s16, %s717_s16 }
  0xe4   : > { %p3099_p10 = scmp.lt.s32.totalorder %s3097_s14, %s3090_s4 }
  0xe5   : > { %p3093_p6 = pnand %p3091_p4, %p3313_p7 }
  0xe6   : > { %p3100_p11 = por %p3099_p10, %p3098_p9 }
  0xe7   : > { %p3094_p8 = pneg %p3093_p6 }
  0xe9   : > { %p3101_p12 = pnand %p3100_p11, %p3094_p8 }
  0xeb   : > { %3104 = shalt.err (!%p3101_p12)
}
  0xec   : > { %2827 = dma.hbm_to_vmem [thread:$0]  (!%p3297_p5), %s4080_s19, 16, %s717_s16, [#allocation14]  }
  0xed   : > { %p4126_p2 = scmp.ne.s32.totalorder %s4116_s2, 0 }
  0xee   : > { %p4127_p3 = scmp.ne.s32.totalorder (!%p4126_p2), %s4115_s6, 0 }
  0xef   : > { %779 = sbr.rel (%p4126_p2) target bundleno = 2876 (0xb3c), region = 116 }
  0xf6   : > { %3110 = dma.done.wait (%p4127_p3), [#allocation3], 1024  }
  0xf7   : > { %3112 = vsyncadd (%p4127_p3), [#allocation3], 4294966272 }
  0xf8   : > { %3114 = dma.done.wait (%p4127_p3), [#allocation5], 8224  }
  0xf9   : > { %3116 = vsyncadd (%p4127_p3), [#allocation5], 4294959072 }
  0xfa   : > { %3118 = dma.done.wait (%p4127_p3), [#allocation8], 544  }
  0xfb   : > { %3120 = vsyncadd (%p4127_p3), [#allocation8], 4294966752 }
  0xfc   : > { %3122 = dma.done.wait (%p4127_p3), [#allocation11], 528  }
  0xfd   : > { %3124 = vsyncadd (%p4127_p3), [#allocation11], 4294966768 }
  0xfe   : > { %3126 = dma.done.wait (%p4127_p3), [#allocation14], 16  }
  0xff   : > { %3128 = vsyncadd (%p4127_p3), [#allocation14], 4294967280  ;;  %s4128_s7 = sld [smem:[#allocation26_spill]]  ;;  %s4129_s2 = sadd.s32 4294967295, %s3131_s5   ;;  %v1088_v50 = vld [vmem:[#allocation6 + $0x8] sm:$0xff]  ;;  %v1090_v51 = vld [vmem:[#allocation6 + $0x18] sm:$0xff] }
 0x100   : > { %s2332_s16 = sshll.u32 %s4129_s2, 1  ;;  %s4130_s2 = sld [smem:[#allocation21_spill]]  ;;  %v1087_v52 = vld [vmem:[#allocation6] sm:$0xff]  ;;  %v2587_v53 = vpack.c.bf16 %v1090_v51, %v1088_v50  ;;  %v1089_v54 = vld [vmem:[#allocation6 + $0x10] sm:$0xff]  ;;  %v1092_v55 = vld [vmem:[#allocation6 + $0x28] sm:$0xff]  ;;  %vm1260_vm0 = vcmask 261120  }
 0x101   : > { %p891_p5 = scmp.lt.s32.totalorder %s2332_s16, 7  ;;  %v1094_v56 = vld [vmem:[#allocation6 + $0x38] sm:$0xff]  ;;  %v2589_v58 = vpack.c.bf16 %v1089_v54, %v1087_v52  ;;  %v1091_v60 = vld [vmem:[#allocation6 + $0x20] sm:$0xff]  ;;  %v1093_v61 = vld [vmem:[#allocation6 + $0x30] sm:$0xff]  ;;  %s4131_s30 = sld [smem:[#allocation22_spill]]  ;;  %vm2010_vm3 = vcmask 523264  }
 0x102   : > { %v2591_v59 = vpack.c.bf16 %v1094_v56, %v1092_v55  ;;  %v1096_v62 = vld [vmem:[#allocation6 + $0x48] sm:$0xff]  ;;  %2588 = vmatprep.subr.bf16.mxu1 %v2587_v53  ;;  %v1111_v55 = vld [vmem:[#allocation6 + $0xc0] sm:$0xff]  ;;  %v1113_v56 = vld [vmem:[#allocation6 + $0xd0] sm:$0xff]  ;;  %s4133_s28 = sld [smem:[#allocation25_spill]]  ;;  %s4135_s27 = sld [smem:[#allocation32_spill]] }
 0x103   : > { %s4142_s16 = smov (!%p891_p5, %s2332_s16), 7  ;;  %2590 = vmatpush1.bf16.msra.mxu1 %v2589_v58  ;;  %s4137_s4 = sld [smem:[#allocation33_spill]] }
 0x104   : > { %s2365_s8 = sshll.u32 %s4142_s16, 4  ;;  %2592 = vmatprep.subr.bf16.mxu1 %v2591_v59  ;;  %v1116_v59 = vld [vmem:[#allocation6 + $0xe8] sm:$0xff]  ;;  %s4138_s1 = sld [smem:[#allocation34_spill]] }
 0x105   : > { %v935_v0 = vld [vmem:[%s4128_s7 + $0x8] sm:$0xff]  ;;  %v937_v1 = vld [vmem:[%s4128_s7 + $0x18] sm:$0xff]  ;;  %v934_v2 = vld [vmem:[%s4128_s7] sm:$0xff] }
 0x106   : > { %v2523_v3 = vpack.c.bf16 %v937_v1, %v935_v0  ;;  %v936_v4 = vld [vmem:[%s4128_s7 + $0x10] sm:$0xff]  ;;  %v939_v5 = vld [vmem:[%s4128_s7 + $0x28] sm:$0xff]  ;;  %v941_v6 = vld [vmem:[%s4128_s7 + $0x38] sm:$0xff]  ;;  %s3587_s24 = scalar_lea.vmem %s4130_s2, %s2365_s8  ;;  %s3715_s2 = sshll.u32 %s4142_s16, 3 }
 0x107   : > { %v2525_v7 = vpack.c.bf16 %v936_v4, %v934_v2  ;;  %v2527_v8 = vpack.c.bf16 %v941_v6, %v939_v5  ;;  %v938_v9 = vld [vmem:[%s4128_s7 + $0x20] sm:$0xff]  ;;  %v940_v10 = vld [vmem:[%s4128_s7 + $0x30] sm:$0xff]  ;;  %v943_v11 = vld [vmem:[%s4128_s7 + $0x48] sm:$0xff]  ;;  %v2593_v5 = vpack.c.bf16 %v1093_v61, %v1091_v60  ;;  %s3667_s0 = scalar_lea.vmem %s4131_s30, %s2365_s8  ;;  %s4132_s30 = sld [smem:[#allocation20_spill]] }
 0x108   : > { %2524 = vmatprep.subr.bf16.mxu0 %v2523_v3  ;;  %v945_v12 = vld [vmem:[%s4128_s7 + $0x58] sm:$0xff]  ;;  %v2529_v13 = vpack.c.bf16 %v940_v10, %v938_v9  ;;  %v942_v15 = vld [vmem:[%s4128_s7 + $0x40] sm:$0xff]  ;;  %v944_v16 = vld [vmem:[%s4128_s7 + $0x50] sm:$0xff]  ;;  %s4136_s8 = sld [smem:[#allocation31_spill]] }
 0x109   : > { %2526 = vmatpush1.bf16.msra.mxu0 %v2525_v7  ;;  %v2531_v14 = vpack.c.bf16 %v945_v12, %v943_v11  ;;  %v947_v17 = vld [vmem:[%s4128_s7 + $0x68] sm:$0xff]  ;;  %v949_v18 = vld [vmem:[%s4128_s7 + $0x78] sm:$0xff]  ;;  %v2533_v19 = vpack.c.bf16 %v944_v16, %v942_v15  ;;  %v946_v21 = vld [vmem:[%s4128_s7 + $0x60] sm:$0xff]  ;;  %2594 = vmatpush1.bf16.msra.mxu1 %v2593_v5 }
 0x10a   : > { %2528 = vmatprep.subr.bf16.mxu0 %v2527_v8  ;;  %v2535_v20 = vpack.c.bf16 %v949_v18, %v947_v17  ;;  %v948_v22 = vld [vmem:[%s4128_s7 + $0x70] sm:$0xff]  ;;  %v951_v23 = vld [vmem:[%s4128_s7 + $0x88] sm:$0xff]  ;;  %v953_v24 = vld [vmem:[%s4128_s7 + $0x98] sm:$0xff] }
 0x10b   : > { %v2537_v25 = vpack.c.bf16 %v948_v22, %v946_v21  ;;  %v2539_v26 = vpack.c.bf16 %v953_v24, %v951_v23  ;;  %v950_v27 = vld [vmem:[%s4128_s7 + $0x80] sm:$0xff]  ;;  %v952_v28 = vld [vmem:[%s4128_s7 + $0x90] sm:$0xff]  ;;  %v955_v29 = vld [vmem:[%s4128_s7 + $0xa8] sm:$0xff] }
 0x10c   : > { %v957_v30 = vld [vmem:[%s4128_s7 + $0xb8] sm:$0xff]  ;;  %v2541_v31 = vpack.c.bf16 %v952_v28, %v950_v27  ;;  %v954_v33 = vld [vmem:[%s4128_s7 + $0xa0] sm:$0xff]  ;;  %v956_v34 = vld [vmem:[%s4128_s7 + $0xb0] sm:$0xff] }
 0x10d   : > { %2530 = vmatpush1.bf16.msra.mxu0 %v2529_v13  ;;  %v2543_v32 = vpack.c.bf16 %v957_v30, %v955_v29  ;;  %v959_v35 = vld [vmem:[%s4128_s7 + $0xc8] sm:$0xff]  ;;  %v961_v36 = vld [vmem:[%s4128_s7 + $0xd8] sm:$0xff]  ;;  %v2545_v37 = vpack.c.bf16 %v956_v34, %v954_v33  ;;  %v958_v39 = vld [vmem:[%s4128_s7 + $0xc0] sm:$0xff]  ;;  %s894_s16 = scalar_lea.vmem %s4132_s30, %s3715_s2  ;;  %s4140_s30 = sld [smem:[#allocation36_spill]] }
 0x10e   : > { %2532 = vmatprep.subr.bf16.mxu0 %v2531_v14  ;;  %v2547_v38 = vpack.c.bf16 %v961_v36, %v959_v35  ;;  %v960_v40 = vld [vmem:[%s4128_s7 + $0xd0] sm:$0xff]  ;;  %v925_v41 = vld [vmem:[%s3587_s24 + $0x8] sm:$0xff]  ;;  %v965_v43 = vld [vmem:[%s4128_s7 + $0xf8] sm:$0xff] }
 0x10f   : > { %v963_v42 = vld [vmem:[%s4128_s7 + $0xe8] sm:$0xff]  ;;  %1074 = vmatprep.mubr.f32.mxu0 %v925_v41  ;;  %v2549_v44 = vpack.c.bf16 %v960_v40, %v958_v39  ;;  %v962_v45 = vld [vmem:[%s4128_s7 + $0xe0] sm:$0xff]  ;;  %v964_v47 = vld [vmem:[%s4128_s7 + $0xf0] sm:$0xff] }
 0x110   : > { %v2551_v46 = vpack.c.bf16 %v965_v43, %v963_v42  ;;  %v967_v48 = vld [vmem:[%s4128_s7 + $0x108] sm:$0xff]  ;;  %v969_v49 = vld [vmem:[%s4128_s7 + $0x118] sm:$0xff]  ;;  %v2553_v57 = vpack.c.bf16 %v964_v47, %v962_v45  ;;  %v966_v0 = vld [vmem:[%s4128_s7 + $0x100] sm:$0xff] }
 0x111   : > { %2534 = vmatpush1.bf16.msra.mxu0 %v2533_v19  ;;  %v2555_v63 = vpack.c.bf16 %v969_v49, %v967_v48  ;;  %v968_v1 = vld [vmem:[%s4128_s7 + $0x110] sm:$0xff]  ;;  %v1098_v2 = vld [vmem:[#allocation6 + $0x58] sm:$0xff]  ;;  %v971_v3 = vld [vmem:[%s4128_s7 + $0x128] sm:$0xff] }
 0x112   : > { %2536 = vmatprep.subr.bf16.mxu0 %v2535_v20  ;;  %v973_v4 = vld [vmem:[%s4128_s7 + $0x138] sm:$0xff]  ;;  %v2595_v6 = vpack.c.bf16 %v1098_v2, %v1096_v62  ;;  %v1095_v7 = vld [vmem:[#allocation6 + $0x40] sm:$0xff]  ;;  %v2557_v9 = vpack.c.bf16 %v968_v1, %v966_v0  ;;  %v1100_v10 = vld [vmem:[#allocation6 + $0x68] sm:$0xff]  ;;  %v2613_v2 = vpack.c.bf16 %v1113_v56, %v1111_v55 }
 0x113   : > { %v1097_v8 = vld [vmem:[#allocation6 + $0x50] sm:$0xff]  ;;  %v1102_v11 = vld [vmem:[#allocation6 + $0x78] sm:$0xff]  ;;  %v2559_v12 = vpack.c.bf16 %v973_v4, %v971_v3  ;;  %v975_v15 = vld [vmem:[%s4128_s7 + $0x148] sm:$0xff] }
 0x114   : > { %v970_v13 = vld [vmem:[%s4128_s7 + $0x120] sm:$0xff]  ;;  %v972_v14 = vld [vmem:[%s4128_s7 + $0x130] sm:$0xff]  ;;  %v977_v16 = vld [vmem:[%s4128_s7 + $0x158] sm:$0xff]  ;;  %v2597_v17 = vpack.c.bf16 %v1097_v8, %v1095_v7  ;;  %2596 = vmatprep.subr.bf16.mxu1 %v2595_v6  ;;  %v2599_v18 = vpack.c.bf16 %v1102_v11, %v1100_v10 }
 0x115   : > { %2538 = vmatpush1.bf16.msra.mxu0 %v2537_v25  ;;  %v1099_v19 = vld [vmem:[#allocation6 + $0x60] sm:$0xff]  ;;  %v1101_v20 = vld [vmem:[#allocation6 + $0x70] sm:$0xff]  ;;  %v2561_v21 = vpack.c.bf16 %v972_v14, %v970_v13  ;;  %v1104_v22 = vld [vmem:[#allocation6 + $0x88] sm:$0xff]  ;;  %v2563_v24 = vpack.c.bf16 %v977_v16, %v975_v15 }
 0x116   : > { %2540 = vmatprep.subr.bf16.mxu0 %v2539_v26  ;;  %v1106_v23 = vld [vmem:[#allocation6 + $0x98] sm:$0xff]  ;;  %v976_v26 = vld [vmem:[%s4128_s7 + $0x150] sm:$0xff]  ;;  %v979_v27 = vld [vmem:[%s4128_s7 + $0x168] sm:$0xff]  ;;  %2598 = vmatpush1.bf16.msra.mxu1 %v2597_v17  ;;  %v2601_v29 = vpack.c.bf16 %v1101_v20, %v1099_v19 }
 0x117   : > { %v974_v25 = vld [vmem:[%s4128_s7 + $0x140] sm:$0xff]  ;;  %v981_v28 = vld [vmem:[%s4128_s7 + $0x178] sm:$0xff]  ;;  %2600 = vmatprep.subr.bf16.mxu1 %v2599_v18  ;;  %v2603_v30 = vpack.c.bf16 %v1106_v23, %v1104_v22  ;;  %v1108_v34 = vld [vmem:[#allocation6 + $0xa8] sm:$0xff] }
 0x118   : > { %v2565_v33 = vpack.c.bf16 %v976_v26, %v974_v25  ;;  %v1110_v35 = vld [vmem:[#allocation6 + $0xb8] sm:$0xff]  ;;  %v2567_v36 = vpack.c.bf16 %v981_v28, %v979_v27  ;;  %v983_v39 = vld [vmem:[%s4128_s7 + $0x188] sm:$0xff]  ;;  %v984_v50 = vld [vmem:[%s4128_s7 + $0x190] sm:$0xff] }
 0x119   : > { %2542 = vmatpush1.bf16.msra.mxu0 %v2541_v31  ;;  %v1103_v31 = vld [vmem:[#allocation6 + $0x80] sm:$0xff]  ;;  %v985_v40 = vld [vmem:[%s4128_s7 + $0x198] sm:$0xff]  ;;  %v2607_v42 = vpack.c.bf16 %v1110_v35, %v1108_v34  ;;  %v1120_v7 = vld [vmem:[#allocation6 + $0x108] sm:$0xff] }
 0x11a   : > { %2544 = vmatprep.subr.bf16.mxu0 %v2543_v32  ;;  %v1105_v32 = vld [vmem:[#allocation6 + $0x90] sm:$0xff]  ;;  %2602 = vmatpush1.bf16.msra.mxu1 %v2601_v29  ;;  %v1107_v43 = vld [vmem:[#allocation6 + $0xa0] sm:$0xff]  ;;  %v1114_v47 = vld [vmem:[#allocation6 + $0xd8] sm:$0xff]  ;;  %v2571_v48 = vpack.c.bf16 %v985_v40, %v983_v39 }
 0x11b   : > { %v2605_v41 = vpack.c.bf16 %v1105_v32, %v1103_v31  ;;  %2604 = vmatprep.subr.bf16.mxu1 %v2603_v30  ;;  %v982_v49 = vld [vmem:[%s4128_s7 + $0x180] sm:$0xff]  ;;  %v987_v51 = vld [vmem:[%s4128_s7 + $0x1a8] sm:$0xff]  ;;  %v989_v52 = vld [vmem:[%s4128_s7 + $0x1b8] sm:$0xff] }
 0x11c   : > { %v2573_v58 = vpack.c.bf16 %v984_v50, %v982_v49  ;;  %v1118_v60 = vld [vmem:[#allocation6 + $0xf8] sm:$0xff]  ;;  %v2575_v61 = vpack.c.bf16 %v989_v52, %v987_v51  ;;  %v991_v0 = vld [vmem:[%s4128_s7 + $0x1c8] sm:$0xff]  ;;  %v1117_v5 = vld [vmem:[#allocation6 + $0xf0] sm:$0xff] }
 0x11d   : > { %2546 = vmatpush1.bf16.msra.mxu0 %v2545_v37  ;;  %v978_v37 = vld [vmem:[%s4128_s7 + $0x160] sm:$0xff]  ;;  %v993_v1 = vld [vmem:[%s4128_s7 + $0x1d8] sm:$0xff]  ;;  %v2615_v3 = vpack.c.bf16 %v1118_v60, %v1116_v59  ;;  %v992_v11 = vld [vmem:[%s4128_s7 + $0x1d0] sm:$0xff] }
 0x11e   : > { %2548 = vmatprep.subr.bf16.mxu0 %v2547_v38  ;;  %v980_v38 = vld [vmem:[%s4128_s7 + $0x170] sm:$0xff]  ;;  %2606 = vmatpush1.bf16.msra.mxu1 %v2605_v41  ;;  %v986_v62 = vld [vmem:[%s4128_s7 + $0x1a0] sm:$0xff]  ;;  %v997_v13 = vld [vmem:[%s4128_s7 + $0x1f8] sm:$0xff] }
 0x11f   : > { %v2569_v45 = vpack.c.bf16 %v980_v38, %v978_v37  ;;  %2608 = vmatprep.subr.bf16.mxu1 %v2607_v42  ;;  %v1115_v4 = vld [vmem:[#allocation6 + $0xe0] sm:$0xff]  ;;  %v1122_v8 = vld [vmem:[#allocation6 + $0x118] sm:$0xff]  ;;  %v1121_v17 = vld [vmem:[#allocation6 + $0x110] sm:$0xff] }
 0x120   : > { %v990_v10 = vld [vmem:[%s4128_s7 + $0x1c0] sm:$0xff]  ;;  %v2617_v14 = vpack.c.bf16 %v1117_v5, %v1115_v4  ;;  %v2619_v15 = vpack.c.bf16 %v1122_v8, %v1120_v7  ;;  %v1124_v19 = vld [vmem:[#allocation6 + $0x128] sm:$0xff]  ;;  %v1243_v25 = vld [vmem:[#allocation2 + $0x18] sm:$0xff] }
 0x121   : > { %2550 = vmatpush1.bf16.msra.mxu0 %v2549_v44  ;;  %v1109_v44 = vld [vmem:[#allocation6 + $0xb0] sm:$0xff]  ;;  %v1119_v16 = vld [vmem:[#allocation6 + $0x100] sm:$0xff]  ;;  %v2581_v18 = vpack.c.bf16 %v992_v11, %v990_v10  ;;  %v1126_v20 = vld [vmem:[#allocation6 + $0x138] sm:$0xff] }
 0x122   : > { %2552 = vmatprep.subr.bf16.mxu0 %v2551_v46  ;;  %v1112_v46 = vld [vmem:[#allocation6 + $0xc8] sm:$0xff]  ;;  %v2609_v53 = vpack.c.bf16 %v1109_v44, %v1107_v43  ;;  %v994_v22 = vld [vmem:[%s4128_s7 + $0x1e0] sm:$0xff]  ;;  %v2621_v26 = vpack.c.bf16 %v1121_v17, %v1119_v16  ;;  %v2623_v27 = vpack.c.bf16 %v1126_v20, %v1124_v19  ;;  %v1125_v29 = vld [vmem:[#allocation6 + $0x130] sm:$0xff] }
 0x123   : > { %v2611_v54 = vpack.c.bf16 %v1114_v47, %v1112_v46  ;;  %v996_v23 = vld [vmem:[%s4128_s7 + $0x1f0] sm:$0xff]  ;;  %v1123_v28 = vld [vmem:[#allocation6 + $0x120] sm:$0xff]  ;;  %v1130_v32 = vld [vmem:[#allocation6 + $0x158] sm:$0xff] }
 0x124   : > { %2610 = vmatpush1.bf16.msra.mxu1 %v2609_v53  ;;  %v2585_v30 = vpack.c.bf16 %v996_v23, %v994_v22  ;;  %v1128_v31 = vld [vmem:[#allocation6 + $0x148] sm:$0xff]  ;;  %v1240_v34 = vld [vmem:[#allocation2] sm:$0xff]  ;;  %v1247_v37 = vld [vmem:[#allocation2 + $0x38] sm:$0xff]  ;;  %v2625_v38 = vpack.c.bf16 %v1125_v29, %v1123_v28 }
 0x125   : > { %2554 = vmatpush1.bf16.msra.mxu0 %v2553_v57  ;;  %v929_v57 = vld [vmem:[%s3667_s0 + $0x8] sm:$0xff]  ;;  %2612 = vmatprep.subr.bf16.mxu1 %v2611_v54  ;;  %v1242_v35 = vld [vmem:[#allocation2 + $0x10] sm:$0xff]  ;;  %v2627_v39 = vpack.c.bf16 %v1130_v32, %v1128_v31  ;;  %v924_v42 = vld [vmem:[%s3587_s24] sm:$0xff] }
 0x126   : > { %2556 = vmatprep.subr.bf16.mxu0 %v2555_v63  ;;  %1227 = vmatprep.mubr.f32.mxu1 %v929_v57  ;;  %v988_v63 = vld [vmem:[%s4128_s7 + $0x1b0] sm:$0xff]  ;;  %v1127_v40 = vld [vmem:[#allocation6 + $0x140] sm:$0xff]  ;;  %v2653_v43 = vpack.c.bf16 %v1242_v35, %v1240_v34  ;;  %v927_v46 = vld [vmem:[%s3587_s24 + $0x18] sm:$0xff] }
 0x127   : > { %v2577_v6 = vpack.c.bf16 %v988_v63, %v986_v62  ;;  %v1129_v41 = vld [vmem:[#allocation6 + $0x150] sm:$0xff]  ;;  %v1132_v44 = vld [vmem:[#allocation6 + $0x168] sm:$0xff]  ;;  %v1131_v52 = vld [vmem:[#allocation6 + $0x160] sm:$0xff]  ;;  %v3145_v62 = vmov 0.0  }
 0x128   : > { %2614 = vmatpush1.bf16.msra.mxu1 %v2613_v2  ;;  %v1246_v49 = vld [vmem:[#allocation2 + $0x30] sm:$0xff]  ;;  %v2629_v50 = vpack.c.bf16 %v1129_v41, %v1127_v40  ;;  %v1138_v57 = vld [vmem:[#allocation6 + $0x198] sm:$0xff]  ;;  %v1135_v60 = vld [vmem:[#allocation6 + $0x180] sm:$0xff] }
 0x129   : > { %2558 = vmatpush1.bf16.msra.mxu0 %v2557_v9  ;;  %v2579_v9 = vpack.c.bf16 %v993_v1, %v991_v0  ;;  %2616 = vmatprep.subr.bf16.mxu1 %v2615_v3  ;;  %v1133_v53 = vld [vmem:[#allocation6 + $0x170] sm:$0xff]  ;;  %v1136_v56 = vld [vmem:[#allocation6 + $0x188] sm:$0xff]  ;;  %v3723_v63 = vld [vmem:[%s894_s16] sm:$0xff] }
 0x12a   : > { %2560 = vmatprep.subr.bf16.mxu0 %v2559_v12  ;;  %v995_v12 = vld [vmem:[%s4128_s7 + $0x1e8] sm:$0xff]  ;;  %v926_v54 = vld [vmem:[%s3587_s24 + $0x10] sm:$0xff]  ;;  %v2635_v59 = vpack.c.bf16 %v1138_v57, %v1136_v56  ;;  %v1142_v1 = vld [vmem:[#allocation6 + $0x1b8] sm:$0xff]  ;;  %s4134_s24 = sld [smem:[#allocation23_spill]] }
 0x12b   : > { %v1140_v0 = vld [vmem:[#allocation6 + $0x1a8] sm:$0xff]  ;;  %v1139_v4 = vld [vmem:[#allocation6 + $0x1a0] sm:$0xff]  ;;  %v1141_v5 = vld [vmem:[#allocation6 + $0x1b0] sm:$0xff] }
 0x12c   : > { %2618 = vmatpush1.bf16.msra.mxu1 %v2617_v14  ;;  %v2639_v3 = vpack.c.bf16 %v1142_v1, %v1140_v0  ;;  %v1144_v7 = vld [vmem:[#allocation6 + $0x1c8] sm:$0xff]  ;;  %v1146_v8 = vld [vmem:[#allocation6 + $0x1d8] sm:$0xff]  ;;  %v1143_v11 = vld [vmem:[#allocation6 + $0x1c0] sm:$0xff] }
 0x12d   : > { %2562 = vmatpush1.bf16.msra.mxu0 %v2561_v21  ;;  %v2583_v21 = vpack.c.bf16 %v997_v13, %v995_v12  ;;  %2620 = vmatprep.subr.bf16.mxu1 %v2619_v15  ;;  %v2643_v10 = vpack.c.bf16 %v1146_v8, %v1144_v7  ;;  %v1145_v12 = vld [vmem:[#allocation6 + $0x1d0] sm:$0xff]  ;;  %v1148_v13 = vld [vmem:[#allocation6 + $0x1e8] sm:$0xff]  ;;  %v1150_v14 = vld [vmem:[#allocation6 + $0x1f8] sm:$0xff] }
 0x12e   : > { %2564 = vmatprep.subr.bf16.mxu0 %v2563_v24  ;;  %v1241_v24 = vld [vmem:[#allocation2 + $0x8] sm:$0xff]  ;;  %v2645_v15 = vpack.c.bf16 %v1145_v12, %v1143_v11  ;;  %v2647_v16 = vpack.c.bf16 %v1150_v14, %v1148_v13  ;;  %v1364_v19 = vld [vmem:[%s4071_s10 + $0x80] sm:$0xff]  ;;  %v1351_v31 = vld [vmem:[%s4071_s10 + $0x18] sm:$0xff] }
 0x12f   : > { %v1147_v17 = vld [vmem:[#allocation6 + $0x1e0] sm:$0xff]  ;;  %v931_v1 = vld [vmem:[%s3667_s0 + $0x18] sm:$0xff]  ;;  %v1362_v7 = vld [vmem:[%s4071_s10 + $0x70] sm:$0xff] }
 0x130   : > { %2622 = vmatpush1.bf16.msra.mxu1 %v2621_v26  ;;  %v1365_v20 = vld [vmem:[%s4071_s10 + $0x88] sm:$0xff]  ;;  %v1348_v23 = vld [vmem:[%s4071_s10] sm:$0xff]  ;;  %v1367_v26 = vld [vmem:[%s4071_s10 + $0x98] sm:$0xff]  ;;  %s914_s6 = scalar_lea.vmem %s4134_s24, %s3715_s2 }
 0x131   : > { %2566 = vmatpush1.bf16.msra.mxu0 %v2565_v33  ;;  %v2651_v33 = vpack.c.bf16 %v1243_v25, %v1241_v24  ;;  %2624 = vmatprep.subr.bf16.mxu1 %v2623_v27  ;;  %v2659_v22 = vpack.c.bf16 %v1365_v20, %v1364_v19  ;;  %v1349_v24 = vld [vmem:[%s4071_s10 + $0x8] sm:$0xff]  ;;  %v1366_v25 = vld [vmem:[%s4071_s10 + $0x90] sm:$0xff]  ;;  %v928_v27 = vld [vmem:[%s3667_s0] sm:$0xff] }
 0x132   : > { %2568 = vmatprep.subr.bf16.mxu0 %v2567_v36  ;;  %v1245_v36 = vld [vmem:[#allocation2 + $0x28] sm:$0xff]  ;;  %v2661_v28 = vpack.c.bf16 %v1349_v24, %v1348_v23  ;;  %v2663_v29 = vpack.c.bf16 %v1367_v26, %v1366_v25  ;;  %v1368_v32 = vld [vmem:[%s4071_s10 + $0xa0] sm:$0xff]  ;;  %v1363_v8 = vld [vmem:[%s4071_s10 + $0x78] sm:$0xff] }
 0x133   : > { %v2655_v47 = vpack.c.bf16 %v1247_v37, %v1245_v36  ;;  %v1352_v36 = vld [vmem:[%s4071_s10 + $0x20] sm:$0xff]  ;;  %v1353_v37 = vld [vmem:[%s4071_s10 + $0x28] sm:$0xff] }
 0x134   : > { %2626 = vmatpush1.bf16.msra.mxu1 %v2625_v38  ;;  %v1370_v38 = vld [vmem:[%s4071_s10 + $0xb0] sm:$0xff]  ;;  %v2669_v40 = vpack.c.bf16 %v1353_v37, %v1352_v36  ;;  %v1376_v57 = vld [vmem:[%s4071_s10 + $0xe0] sm:$0xff] }
 0x135   : > { %2570 = vmatpush1.bf16.msra.mxu0 %v2569_v45  ;;  %v1134_v45 = vld [vmem:[#allocation6 + $0x178] sm:$0xff]  ;;  %2628 = vmatprep.subr.bf16.mxu1 %v2627_v39 }
 0x136   : > { %2572 = vmatprep.subr.bf16.mxu0 %v2571_v48  ;;  %v1244_v48 = vld [vmem:[#allocation2 + $0x20] sm:$0xff]  ;;  %v2631_v51 = vpack.c.bf16 %v1134_v45, %v1132_v44  ;;  %v1371_v39 = vld [vmem:[%s4071_s10 + $0xb8] sm:$0xff]  ;;  %v1373_v45 = vld [vmem:[%s4071_s10 + $0xc8] sm:$0xff] }
 0x137   : > { %v2657_v55 = vpack.c.bf16 %v1246_v49, %v1244_v48  ;;  %v2671_v41 = vpack.c.bf16 %v1371_v39, %v1370_v38  ;;  %v1372_v44 = vld [vmem:[%s4071_s10 + $0xc0] sm:$0xff]  ;;  %v1357_v49 = vld [vmem:[%s4071_s10 + $0x48] sm:$0xff] }
 0x138   : > { %2630 = vmatpush1.bf16.msra.mxu1 %v2629_v50  ;;  %v1356_v48 = vld [vmem:[%s4071_s10 + $0x40] sm:$0xff] }
 0x139   : > { %2574 = vmatpush1.bf16.msra.mxu0 %v2573_v58  ;;  %v2633_v58 = vpack.c.bf16 %v1133_v53, %v1131_v52  ;;  %2632 = vmatprep.subr.bf16.mxu1 %v2631_v51  ;;  %v2677_v50 = vpack.c.bf16 %v1357_v49, %v1356_v48  ;;  %v1374_v51 = vld [vmem:[%s4071_s10 + $0xd0] sm:$0xff]  ;;  %v1375_v52 = vld [vmem:[%s4071_s10 + $0xd8] sm:$0xff]  ;;  %v932_v48 = vld [vmem:[%s914_s6] sm:$0xff] }
 0x13a   : > { %2576 = vmatprep.subr.bf16.mxu0 %v2575_v61  ;;  %v1137_v61 = vld [vmem:[#allocation6 + $0x190] sm:$0xff]  ;;  %v2679_v53 = vpack.c.bf16 %v1375_v52, %v1374_v51  ;;  %vm1455_vm1 = vcmp.eq.f32.partialorder %v932_v48, 0.0  ;;  %v933_v52 = vld [vmem:[%s914_s6 + $0x8] sm:$0xff] }
 0x13b   : > { %v2637_v2 = vpack.c.bf16 %v1137_v61, %v1135_v60  ;;  %v1360_v60 = vld [vmem:[%s4071_s10 + $0x60] sm:$0xff]  ;;  %v1361_v61 = vld [vmem:[%s4071_s10 + $0x68] sm:$0xff]  ;;  %vm1456_vm2 = vcmp.eq.f32.partialorder %v933_v52, 0.0 }
 0x13c   : > { %2634 = vmatpush1.bf16.msra.mxu1 %v2633_v58  ;;  %v1377_v58 = vld [vmem:[%s4071_s10 + $0xe8] sm:$0xff]  ;;  %v2685_v0 = vpack.c.bf16 %v1361_v61, %v1360_v60  ;;  %v1659_v52 = vld [vmem:[%s4074_s13 + $0x20] sm:$0xff] }
 0x13d   : > { %2578 = vmatpush1.bf16.msra.mxu0 %v2577_v6  ;;  %2636 = vmatprep.subr.bf16.mxu1 %v2635_v59  ;;  %v3728_v6 = vld [vmem:[%s894_s16 + $0x8] sm:$0xff]  ;;  %v2683_v59 = vpack.c.bf16 %v1377_v58, %v1376_v57  ;;  %s920_s16 = scalar_lea.vmem %s4140_s30, %s3715_s2 }
 0x13e   : > { %2580 = vmatprep.subr.bf16.mxu0 %v2579_v9  ;;  %v2641_v9 = vpack.c.bf16 %v1141_v5, %v1139_v4  ;;  %v930_v4 = vld [vmem:[%s3667_s0 + $0x10] sm:$0xff]  ;;  %v1471_v60 = vld [vmem:[#allocation9] sm:$0xff]  ;;  %s4139_s0 = sld [smem:[#allocation35_spill]] }
 0x13f   : > { %v1472_v61 = vld [vmem:[#allocation9 + $0x8] sm:$0xff] }
 0x140   : > { %2638 = vmatpush1.bf16.msra.mxu1 %v2637_v2  ;;  %v1378_v2 = vld [vmem:[%s4071_s10 + $0xf0] sm:$0xff]  ;;  %v1676_v48 = vld [vmem:[%s4074_s13 + $0xa8] sm:$0xff] }
 0x141   : > { %2582 = vmatpush1.bf16.msra.mxu0 %v2581_v18  ;;  %2640 = vmatprep.subr.bf16.mxu1 %v2639_v3  ;;  %v1149_v18 = vld [vmem:[#allocation6 + $0x1f0] sm:$0xff] }
 0x142   : > { %2584 = vmatprep.subr.bf16.mxu0 %v2583_v21  ;;  %v2649_v21 = vpack.c.bf16 %v1149_v18, %v1147_v17  ;;  %v1379_v3 = vld [vmem:[%s4071_s10 + $0xf8] sm:$0xff]  ;;  %v1248_v17 = vld [vmem:[%s4133_s28] sm:$0x3] }
 0x143   : > { %v2687_v5 = vpack.c.bf16 %v1379_v3, %v1378_v2  ;;  %v1474_v2 = vld [vmem:[#allocation9 + $0x18] sm:$0xff] }
 0x144   : > { %2642 = vmatpush1.bf16.msra.mxu1 %v2641_v9  ;;  %v2689_v9 = vpack.c.bf16 %v1363_v8, %v1362_v7 }
 0x145   : > { %2586 = vmatpush1.bf16.msra.mxu0 %v2585_v30  ;;  %2644 = vmatprep.subr.bf16.mxu1 %v2643_v10  ;;  %v1350_v30 = vld [vmem:[%s4071_s10 + $0x10] sm:$0xff]  ;;  %v1000_v10 = vlaneseq }
 0x146   : > { %2652 = vmatprep.subr.bf16.mxu0 %v2651_v33  ;;  %v1369_v33 = vld [vmem:[%s4071_s10 + $0xa8] sm:$0xff]  ;;  %v2665_v34 = vpack.c.bf16 %v1351_v31, %v1350_v30 }
 0x147   : > { %v2667_v35 = vpack.c.bf16 %v1369_v33, %v1368_v32  ;;  %v1001_v11 = vshrl.u32 %v1000_v10, 7 }
 0x148   : > { %1075 = vmatmul.mubr.f32.vlgmr.msra.gmra.mrb[0].mxu0 %v924_v42  ;;  %2646 = vmatpush1.bf16.msra.mxu1 %v2645_v15  ;;  %v1354_v42 = vld [vmem:[%s4071_s10 + $0x30] sm:$0xff]  ;;  %v998_v15 = vld [vmem:[#allocation4] sm:$0x3] }
 0x149   : > { %2654 = vmatpush1.bf16.msra.mxu0 %v2653_v43  ;;  %1080 = vmatprep.mubr.f32.mxu0 %v927_v46  ;;  %v1355_v43 = vld [vmem:[%s4071_s10 + $0x38] sm:$0xff]  ;;  %v3831_v13 = vsub.s32 0, %v1001_v11 }
 0x14a   : > { %2656 = vmatprep.subr.bf16.mxu0 %v2655_v47  ;;  %2648 = vmatprep.subr.bf16.mxu1 %v2647_v16  ;;  %v2673_v46 = vpack.c.bf16 %v1355_v43, %v1354_v42  ;;  %v2675_v47 = vpack.c.bf16 %v1373_v45, %v1372_v44  ;;  %v1006_v16 = vsub.s32 1, %v1001_v11 }
 0x14b   : > { %v1003_v19 = vrot.slane %v998_v15, %v3831_v13 }
 0x14c   : > { %1081 = vmatmul.mubr.f32.gmra.mrb[2].mxu0 %v926_v54  ;;  %2650 = vmatpush1.bf16.msra.mxu1 %v2649_v21  ;;  %v1358_v54 = vld [vmem:[%s4071_s10 + $0x50] sm:$0xff]  ;;  %v1253_v21 = vrot.slane %v1248_v17, %v3831_v13  ;;  %v1257_v23 = vrot.slane %v1248_v17, %v1006_v16  ;;  %v1560_v17 = vld [vmem:[%s4073_s12] sm:$0xff] }
 0x14d   : > { %2658 = vmatpush1.bf16.msra.mxu0 %v2657_v55  ;;  %1331 = vmatprep.mubr.f32.mxu0 %v3145_v62  ;;  %v1359_v55 = vld [vmem:[%s4071_s10 + $0x58] sm:$0xff] }
 0x14e   : > { %2660 = vmatprep.subr.bf16.mxu1 %v2659_v22  ;;  %v2681_v56 = vpack.c.bf16 %v1359_v55, %v1358_v54  ;;  %v1007_v22 = vrot.slane %v998_v15, %v1006_v16  ;;  %v1563_v15 = vld [vmem:[%s4073_s12 + $0x18] sm:$0xff] }
 0x14f   : > { %1228 = vmatmul.mubr.f32.vlgmr.msra.gmra.mrb[0].mxu1 %v928_v27 }
 0x150   : > { %2344 = vmatmul.mubr.msk.f32.vlgmr.msra.gmra.mrb[4].mxu0 %vm1260_vm0, %v3723_v63  ;;  %2662 = vmatpush3.bf16.msra.mxu1 %v2661_v28 }
 0x151   : > { %1337 = vmatprep.mubr.f32.mxu0 %v3145_v62  ;;  %2664 = vmatprep.subr.bf16.mxu1 %v2663_v29 }
 0x152   : > { %1233 = vmatprep.mubr.f32.mxu1 %v931_v1  ;;  %v2691_v1 = vpack.c.bf16 %v1472_v61, %v1471_v60  ;;  %v1680_v60 = vld [vmem:[%s4074_s13 + $0xc8] sm:$0xff] }
 0x153   : > { %1234 = vmatmul.mubr.f32.gmra.mrb[2].mxu1 %v930_v4 }
 0x154   : > { %2345 = vmatmul.mubr.msk.f32.gmra.mrb[6].mxu0 %vm1260_vm0, %v3728_v6  ;;  %2666 = vmatpush3.bf16.msra.mxu1 %v2665_v34 }
 0x155   : > { %2668 = vmatprep.subr.bf16.mxu1 %v2667_v35  ;;  %2692 = vmatprep.subr.bf16.mxu0 %v2691_v1 }
 0x156   : > { %2694 = vmatpush3.bf16.msra.mxu0 %v2691_v1  ;;  %v1663_v1 = vld [vmem:[%s4074_s13 + $0x40] sm:$0xff] }
 0x158   : > { %2670 = vmatpush3.bf16.msra.mxu1 %v2669_v40  ;;  %v3838_v40 = vld [vmem:[#allocation7] sm:$0x3] }
 0x159   : > { %2672 = vmatprep.subr.bf16.mxu1 %v2671_v41  ;;  %v1160_v41 = vrot.slane %v3838_v40, %v1006_v16 }
 0x15c   : > { %2674 = vmatpush3.bf16.msra.mxu1 %v2673_v46 }
 0x15d   : > { %2676 = vmatprep.subr.bf16.mxu1 %v2675_v47 }
 0x160   : > { %2678 = vmatpush3.bf16.msra.mxu1 %v2677_v50 }
 0x161   : > { %2680 = vmatprep.subr.bf16.mxu1 %v2679_v53 }
 0x164   : > { %2682 = vmatpush3.bf16.msra.mxu1 %v2681_v56 }
 0x165   : > { %2684 = vmatprep.subr.bf16.mxu1 %v2683_v59 }
 0x168   : > { %2686 = vmatpush3.bf16.msra.mxu1 %v2685_v0  ;;  %v1473_v0 = vld [vmem:[#allocation9 + $0x10] sm:$0xff] }
 0x169   : > { %2688 = vmatprep.subr.bf16.mxu1 %v2687_v5  ;;  %v2695_v3 = vpack.c.bf16 %v1474_v2, %v1473_v0  ;;  %v1664_v2 = vld [vmem:[%s4074_s13 + $0x48] sm:$0xff] }
 0x16b   : > { %2696 = vmatprep.subr.bf16.mxu0 %v2695_v3 }
 0x16c   : > { %2690 = vmatpush3.bf16.msra.mxu1 %v2689_v9  ;;  %2698 = vmatpush3.bf16.msra.mxu0 %v2695_v3  ;;  %v1681_v3 = vld [vmem:[%s4074_s13 + $0xd0] sm:$0xff] }
 0x21b   : > { %v1076_v12 = vpop.f32.mrb[0].mxu0 }
 0x21c   : > { %v1078_v14 = vpop.f32.mrb[1].mxu0  ;;  %v1077_v25 = vadd.f32 %v1076_v12, %v1003_v19 }
 0x21d   : > { %v1079_v28 = vadd.f32 %v1078_v14, %v1007_v22  ;;  %v1561_v14 = vld [vmem:[%s4073_s12 + $0x8] sm:$0xff] }
 0x21e   : > { %v2699_v16 = vpack.c.bf16 %v1563_v15, %v1561_v14  ;;  %v1667_v15 = vld [vmem:[%s4074_s13 + $0x60] sm:$0xff] }
 0x21f   : > { %v1082_v18 = vpop.f32.mrb[2].mxu0 }
 0x220   : > { %v1084_v20 = vpop.f32.mrb[3].mxu0  ;;  %v1083_v33 = vadd.f32 %v1082_v18, %v1003_v19  ;;  %v1562_v18 = vld [vmem:[%s4073_s12 + $0x10] sm:$0xff]  ;;  %2700 = vmatprep.subr.bf16.mxu0 %v2699_v16  ;;  %v1668_v16 = vld [vmem:[%s4074_s13 + $0x68] sm:$0xff] }
 0x221   : > { %v1085_v36 = vadd.f32 %v1084_v20, %v1007_v22  ;;  %v2701_v19 = vpack.c.bf16 %v1562_v18, %v1560_v17  ;;  %v1565_v20 = vld [vmem:[%s4073_s12 + $0x28] sm:$0xff]  ;;  %v2733_v17 = vpack.c.bf16 %v1668_v16, %v1667_v15  ;;  %v1685_v18 = vld [vmem:[%s4074_s13 + $0xf0] sm:$0xff] }
 0x222   : > { %v3841_v42 = vpop.f32.mrb[0].mxu1 }
 0x223   : > { %v1333_v24 = vpop.f32.mrb[4].mxu0  ;;  %v1231_v43 = vpop.f32.mrb[1].mxu1 }
 0x224   : > { %v1334_v26 = vadd.f32 %v1333_v24, %v1253_v21  ;;  %v1335_v27 = vpop.f32.mrb[5].mxu0  ;;  %v3843_v44 = vadd.f32 %v1231_v43, %v1160_v41  ;;  %v1566_v24 = vld [vmem:[%s4073_s12 + $0x30] sm:$0xff] }
 0x225   : > { %v1336_v29 = vadd.f32 %v1335_v27, %v1257_v23  ;;  %v1672_v27 = vld [vmem:[%s4074_s13 + $0x88] sm:$0xff] }
 0x226   : > { %v1344_v30 = vmul.f32 %v1334_v26, %v1077_v25  ;;  %v3845_v45 = vpop.f32.mrb[2].mxu1  ;;  %v1671_v26 = vld [vmem:[%s4074_s13 + $0x80] sm:$0xff] }
 0x227   : > { %v1345_v31 = vmul.f32 %v1336_v29, %v1079_v28  ;;  %v1339_v32 = vpop.f32.mrb[6].mxu0  ;;  %v1237_v46 = vpop.f32.mrb[3].mxu1  ;;  %v2707_v28 = vpack.c.bf16 %v1672_v27, %v1671_v26 }
 0x228   : > { %v1340_v34 = vadd.f32 %v1339_v32, %v1253_v21  ;;  %v1341_v35 = vpop.f32.mrb[7].mxu0  ;;  %v3847_v47 = vadd.f32 %v1237_v46, %v1160_v41  ;;  %v1567_v21 = vld [vmem:[%s4073_s12 + $0x38] sm:$0xff]  ;;  %v1656_v32 = vld [vmem:[%s4074_s13 + $0x8] sm:$0xff]  ;;  %v1675_v46 = vld [vmem:[%s4074_s13 + $0xa0] sm:$0xff] }
 0x229   : > { %v1342_v37 = vadd.f32 %v1341_v35, %v1257_v23  ;;  %1444 = vmatprep.mubr.f32.mxu1 %v1345_v31  ;;  %v2703_v22 = vpack.c.bf16 %v1567_v21, %v1565_v20  ;;  %v1564_v23 = vld [vmem:[%s4073_s12 + $0x20] sm:$0xff]  ;;  %v1658_v41 = vld [vmem:[%s4074_s13 + $0x18] sm:$0xff]  ;;  %v1669_v21 = vld [vmem:[%s4074_s13 + $0x70] sm:$0xff] }
 0x22a   : > { %v1346_v38 = vmul.f32 %v1340_v34, %v1083_v33  ;;  %1445 = vmatmul.mubr.f32.vlgmr.msra.gmra.mrb[4].mxu1 %v1344_v30  ;;  %v2705_v25 = vpack.c.bf16 %v1566_v24, %v1564_v23  ;;  %v1655_v31 = vld [vmem:[%s4074_s13] sm:$0xff]  ;;  %v1673_v33 = vld [vmem:[%s4074_s13 + $0x90] sm:$0xff]  ;;  %v1674_v34 = vld [vmem:[%s4074_s13 + $0x98] sm:$0xff]  ;;  %v1156_v24 = vrot.slane %v3838_v40, %v3831_v13 }
 0x22b   : > { %v1347_v39 = vmul.f32 %v1342_v37, %v1085_v36  ;;  %v2709_v36 = vpack.c.bf16 %v1656_v32, %v1655_v31  ;;  %v1763_v13 = vld [vmem:[#allocation10 + $0x8] sm:$0xff] }
 0x22d   : > { %1449 = vmatprep.mubr.f32.mxu1 %v1347_v39  ;;  %v1657_v39 = vld [vmem:[%s4074_s13 + $0x10] sm:$0xff] }
 0x22e   : > { %1450 = vmatmul.mubr.f32.gmra.mrb[6].mxu1 %v1346_v38  ;;  %v2711_v38 = vpack.c.bf16 %v1674_v34, %v1673_v33 }
 0x2fd   : > { %v2399_v49 = vpop.f32.mrb[4].mxu1 }
 0x2fe   : > { %v2400_v50 = vpop.f32.mrb[5].mxu1 }
 0x2ff   : > { %v2401_v51 = vadd.f32 %v2400_v50, %v2399_v49  ;;  %v2713_v49 = vpack.c.bf16 %v1658_v41, %v1657_v39 }
 0x301   : > { %v2402_v53 = vpop.f32.mrb[6].mxu1  ;;  %v1457_v54 = vsel %vm1455_vm1, -1e+09, %v2401_v51  ;;  %v2715_v51 = vpack.c.bf16 %v1676_v48, %v1675_v46 }
 0x302   : > { %v2403_v55 = vpop.f32.mrb[7].mxu1  ;;  %v1459_v56 = vsel %vm1260_vm0, %v1457_v54, -inf }
 0x303   : > { %v2404_v57 = vadd.f32 %v2403_v55, %v2402_v53  ;;  %1460 = vmax.xlane.f32.xlu0 %v1459_v56  ;;  %v1660_v53 = vld [vmem:[%s4074_s13 + $0x28] sm:$0xff] }
 0x304   : > { %v2717_v55 = vpack.c.bf16 %v1660_v53, %v1659_v52 }
 0x305   : > { %v1458_v58 = vsel %vm1456_vm2, -1e+09, %v2404_v57  ;;  %v1661_v57 = vld [vmem:[%s4074_s13 + $0x30] sm:$0xff] }
 0x306   : > { %v1462_v59 = vsel %vm1260_vm0, %v1458_v58, -inf }
 0x307   : > { %1463 = vmax.xlane.f32.xlu0 %v1462_v59  ;;  %v1679_v59 = vld [vmem:[%s4074_s13 + $0xc0] sm:$0xff] }
 0x308   : > { %v2723_v0 = vpack.c.bf16 %v1680_v60, %v1679_v59 }
 0x390   : > { %v1461_v4 = vpop.xlane.xlu0 %1460 }
 0x391   : > { %v1465_v5 = vsub.f32 %v1457_v54, %v1461_v4  ;;  %v1677_v54 = vld [vmem:[%s4074_s13 + $0xb0] sm:$0xff]  ;;  %v1682_v4 = vld [vmem:[%s4074_s13 + $0xd8] sm:$0xff] }
 0x393   : > { %v1467_v7 = vmul.f32 1.442695, %v1465_v5  ;;  %v2725_v5 = vpack.c.bf16 %v1664_v2, %v1663_v1  ;;  %v1902_v1 = vld [vmem:[%s4079_s18 + $0x8] sm:$0xff] }
 0x394   : > { %v1464_v8 = vpop.xlane.xlu0 %1463 }
 0x395   : > { %2865 = vpow2.f32 %v1467_v7  ;;  %v1466_v9 = vsub.f32 %v1458_v58, %v1464_v8  ;;  %v1662_v58 = vld [vmem:[%s4074_s13 + $0x38] sm:$0xff]  ;;  %v2727_v7 = vpack.c.bf16 %v1682_v4, %v1681_v3  ;;  %v1665_v8 = vld [vmem:[%s4074_s13 + $0x50] sm:$0xff] }
 0x396   : > { %v2721_v61 = vpack.c.bf16 %v1662_v58, %v1661_v57  ;;  %v1903_v3 = vld [vmem:[%s4079_s18 + $0x10] sm:$0xff]  ;;  %v1904_v4 = vld [vmem:[%s4079_s18 + $0x18] sm:$0xff] }
 0x397   : > { %v1469_v10 = vmul.f32 1.442695, %v1466_v9  ;;  %v1666_v9 = vld [vmem:[%s4074_s13 + $0x58] sm:$0xff] }
 0x399   : > { %2867 = vpow2.f32 %v1469_v10  ;;  %v1683_v10 = vld [vmem:[%s4074_s13 + $0xe0] sm:$0xff] }
 0x39f   : > { %v2866_v11 = vpop.eup %2865 }
 0x3a0   : > { %2479 = vmatprep.mubr.msk.f32.mxu0 %vm1260_vm0, %v2866_v11 }
 0x3a3   : > { %v2868_v12 = vpop.eup %2867 }
 0x3a4   : > { %2480 = vmatmul.mubr.msk.f32.vlgmr.msra.gmra.mrb[8].mxu0 %vm1260_vm0, %v2868_v12 }
 0x3a5   : > { %1638 = vmatprep.mubr.f32.mxu0 %v3145_v62  ;;  %2702 = vmatpush1.bf16.msra.mxu0 %v2701_v19  ;;  %v1686_v19 = vld [vmem:[%s4074_s13 + $0xf8] sm:$0xff] }
 0x3a6   : > { %2704 = vmatprep.subr.bf16.mxu0 %v2703_v22  ;;  %v2735_v20 = vpack.c.bf16 %v1686_v19, %v1685_v18  ;;  %v1670_v22 = vld [vmem:[%s4074_s13 + $0x78] sm:$0xff]  ;;  %v2353_v18 = vld [vmem:[%s4136_s8] ss:$0 sm:$0xff] }
 0x3a7   : > { %v2737_v23 = vpack.c.bf16 %v1670_v22, %v1669_v21 }
 0x3a9   : > { %2706 = vmatpush1.bf16.msra.mxu0 %v2705_v25  ;;  %v1230_v25 = vadd.f32 %v3841_v42, %v1156_v24  ;;  %v1764_v42 = vld [vmem:[#allocation10 + $0x10] sm:$0xff] }
 0x3aa   : > { %2708 = vmatprep.subr.bf16.mxu0 %v2707_v28 }
 0x477   : > { %v2481_v29 = vpop.f32.mrb[8].mxu0 }
 0x478   : > { %v1547_v30 = vpop.f32.mrb[9].mxu0 }
 0x479   : > { %2869 = vrcp.f32 %v1547_v30  ;;  %v1236_v30 = vadd.f32 %v3845_v45, %v1156_v24 }
 0x47a   : > { %2871 = vrcp.f32 %v2481_v29 }
 0x483   : > { %v2870_v35 = vpop.eup %2869 }
 0x484   : > { %v1557_v37 = vmul.f32 %v2870_v35, %v2866_v11  ;;  %v2872_v43 = vpop.eup %2871  ;;  %v1684_v11 = vld [vmem:[%s4074_s13 + $0xe8] sm:$0xff] }
 0x485   : > { %v1559_v50 = vmul.f32 %v2872_v43, %v2868_v12  ;;  %v2729_v12 = vpack.c.bf16 %v1666_v9, %v1665_v8  ;;  %v2731_v14 = vpack.c.bf16 %v1684_v11, %v1683_v10  ;;  %v1762_v35 = vld [vmem:[#allocation10] sm:$0xff]  ;;  %v2350_v43 = vld [vmem:[%s4076_s15] ss:$0 sm:$0xff] }
 0x486   : > { %2348 = vmatmul.mubr.msk.f32.vlgmr.msra.gmra.mrb[10].mxu0 %vm1260_vm0, %v1557_v37  ;;  %v2739_v40 = vpack.c.bf16 %v1763_v13, %v1762_v35  ;;  %v1996_v8 = vld [vmem:[%s4135_s27 + $0x8] sm:$0xff]  ;;  %v2355_v13 = vld [vmem:[#allocation13] ss:$0 sm:$0xff] }
 0x487   : > { %1644 = vmatprep.mubr.f32.mxu0 %v3145_v62  ;;  %2710 = vmatpush3.bf16.msra.mxu0 %v2709_v36  ;;  %v1678_v62 = vld [vmem:[%s4074_s13 + $0xb8] sm:$0xff] }
 0x488   : > { %2712 = vmatprep.subr.bf16.mxu0 %v2711_v38  ;;  %v2719_v56 = vpack.c.bf16 %v1678_v62, %v1677_v54  ;;  %2740 = vmatprep.subr.bf16.mxu1 %v2739_v40  ;;  %v1765_v36 = vld [vmem:[#allocation10 + $0x18] sm:$0xff] }
 0x489   : > { %2742 = vmatpush3.bf16.msra.mxu1 %v2739_v40  ;;  %v2743_v37 = vpack.c.bf16 %v1765_v36, %v1764_v42 }
 0x48a   : > { %2349 = vmatmul.mubr.msk.f32.gmra.mrb[12].mxu0 %vm1260_vm0, %v1559_v50 }
 0x48b   : > { %2714 = vmatpush3.bf16.msra.mxu0 %v2713_v49  ;;  %2744 = vmatprep.subr.bf16.mxu1 %v2743_v37 }
 0x48c   : > { %2716 = vmatprep.subr.bf16.mxu0 %v2715_v51 }
 0x48d   : > { %2746 = vmatpush3.bf16.msra.mxu1 %v2743_v37 }
 0x48f   : > { %2718 = vmatpush3.bf16.msra.mxu0 %v2717_v55 }
 0x490   : > { %2720 = vmatprep.subr.bf16.mxu0 %v2719_v56 }
 0x493   : > { %2722 = vmatpush3.bf16.msra.mxu0 %v2721_v61 }
 0x494   : > { %2724 = vmatprep.subr.bf16.mxu0 %v2723_v0 }
 0x497   : > { %2726 = vmatpush3.bf16.msra.mxu0 %v2725_v5  ;;  %v2751_v5 = vpack.c.bf16 %v1904_v4, %v1903_v3  ;;  %v2361_v3 = vld [vmem:[%s4138_s1] ss:$0 sm:$0xff] }
 0x498   : > { %2728 = vmatprep.subr.bf16.mxu0 %v2727_v7  ;;  %v1995_v7 = vld [vmem:[%s4135_s27] sm:$0xff] }
 0x499   : > { %v2755_v9 = vpack.c.bf16 %v1996_v8, %v1995_v7  ;;  %v2362_v8 = vld [vmem:[%s4139_s0] ss:$0 sm:$0xff] }
 0x49b   : > { %2730 = vmatpush3.bf16.msra.mxu0 %v2729_v12 }
 0x49c   : > { %2732 = vmatprep.subr.bf16.mxu0 %v2731_v14 }
 0x49f   : > { %2734 = vmatpush3.bf16.msra.mxu0 %v2733_v17 }
 0x4a0   : > { %2736 = vmatprep.subr.bf16.mxu0 %v2735_v20  ;;  %v2354_v20 = vld [vmem:[#allocation12] ss:$0 sm:$0xff] }
 0x4a3   : > { %2738 = vmatpush3.bf16.msra.mxu0 %v2737_v23 }
 0x559   : > { %v1640_v26 = vpop.f32.mrb[10].mxu0 }
 0x55a   : > { %v1651_v27 = vmul.f32 %v1640_v26, %v1230_v25  ;;  %v1642_v28 = vpop.f32.mrb[11].mxu0  ;;  %v1997_v25 = vld [vmem:[%s4135_s27 + $0x10] sm:$0xff]  ;;  %v1998_v26 = vld [vmem:[%s4135_s27 + $0x18] sm:$0xff] }
 0x55b   : > { %v1652_v29 = vmul.f32 %v1642_v28, %v3843_v44 }
 0x55d   : > { %v1646_v31 = vpop.f32.mrb[12].mxu0  ;;  %1751 = vmatprep.mubr.f32.mxu0 %v1652_v29  ;;  %v2759_v29 = vpack.c.bf16 %v1998_v26, %v1997_v25 }
 0x55e   : > { %v1653_v32 = vmul.f32 %v1646_v31, %v1236_v30  ;;  %v1648_v33 = vpop.f32.mrb[13].mxu0  ;;  %1752 = vmatmul.mubr.f32.vlgmr.msra.gmra.mrb[14].mxu0 %v1651_v27  ;;  %v1999_v30 = vld [vmem:[%s4135_s27 + $0x20] sm:$0xff]  ;;  %v2000_v31 = vld [vmem:[%s4135_s27 + $0x28] sm:$0xff] }
 0x55f   : > { %v1654_v34 = vmul.f32 %v1648_v33, %v3847_v47  ;;  %v2001_v33 = vld [vmem:[%s4135_s27 + $0x30] sm:$0xff] }
 0x561   : > { %1756 = vmatprep.mubr.f32.mxu0 %v1654_v34  ;;  %v2002_v34 = vld [vmem:[%s4135_s27 + $0x38] sm:$0xff] }
 0x562   : > { %1757 = vmatmul.mubr.f32.gmra.mrb[16].mxu0 %v1653_v32  ;;  %v2763_v32 = vpack.c.bf16 %v2000_v31, %v1999_v30  ;;  %v2767_v35 = vpack.c.bf16 %v2002_v34, %v2001_v33 }
 0x631   : > { %v2443_v44 = vpop.f32.mrb[14].mxu0 }
 0x632   : > { %v2444_v45 = vpop.f32.mrb[15].mxu0 }
 0x633   : > { %v2445_v38 = vadd.f32 %v2444_v45, %v2443_v44 }
 0x635   : > { %v2446_v39 = vpop.f32.mrb[16].mxu0  ;;  %2490 = vmatprep.mubr.msk.f32.mxu1 %vm1260_vm0, %v2445_v38  ;;  %v2358_v38 = vld [vmem:[%s4137_s4] ss:$0 sm:$0xff] }
 0x636   : > { %v2447_v41 = vpop.f32.mrb[17].mxu0 }
 0x637   : > { %v2448_v47 = vadd.f32 %v2447_v41, %v2446_v39 }
 0x639   : > { %2491 = vmatmul.mubr.msk.f32.vlgmr.msra.gmra.mrb[8].mxu1 %vm1260_vm0, %v2448_v47 }
 0x70c   : > { %v2492_v46 = vpop.f32.mrb[8].mxu1 }
 0x70d   : > { %v1845_v48 = vpop.f32.mrb[9].mxu1  ;;  %v1851_v49 = vadd.f32 %v2492_v46, %v2350_v43 }
 0x70e   : > { %v1846_v50 = vadd.f32 %v2350_v43, %v1845_v48 }
 0x70f   : > { %v1855_v53 = vadd.f32 %v1851_v49, %v3728_v6  ;;  %v1901_v6 = vld [vmem:[%s4079_s18] sm:$0xff] }
 0x710   : > { %v1854_v51 = vadd.f32 %v1846_v50, %v3723_v63  ;;  %v2747_v2 = vpack.c.bf16 %v1902_v1, %v1901_v6 }
 0x711   : > { %v1861_v54 = vsel %vm1260_vm0, %v1855_v53, 0.0 }
 0x712   : > { %v1858_v52 = vsel %vm1260_vm0, %v1854_v51, 0.0  ;;  %2748 = vmatprep.subr.bf16.mxu1 %v2747_v2 }
 0x713   : > { %1859 = vadd.xlane.f32.xlu1 %v1858_v52  ;;  %2750 = vmatpush3.bf16.msra.mxu1 %v2747_v2 }
 0x714   : > { %2752 = vmatprep.subr.bf16.mxu1 %v2751_v5 }
 0x717   : > { %1862 = vadd.xlane.f32.xlu1 %v1861_v54  ;;  %2754 = vmatpush3.bf16.msra.mxu1 %v2751_v5 }
 0x718   : > { %2756 = vmatprep.subr.bf16.mxu1 %v2755_v9 }
 0x7a0   : > { %v1860_v62 = vpop.xlane.xlu1 %1859 }
 0x7a1   : > { %v1865_v55 = vmul.f32 0.03125, %v1860_v62 }
 0x7a3   : > { %v1867_v56 = vsub.f32 %v1854_v51, %v1865_v55 }
 0x7a4   : > { %v1863_v57 = vpop.xlane.xlu1 %1862 }
 0x7a5   : > { %v1866_v58 = vmul.f32 0.03125, %v1863_v57  ;;  %v1869_v59 = vmul.f32 %v1867_v56, %v1867_v56 }
 0x7a7   : > { %v1868_v60 = vsub.f32 %v1855_v53, %v1866_v58  ;;  %v1871_v61 = vsel %vm1260_vm0, %v1869_v59, 0.0 }
 0x7a8   : > { %1872 = vadd.xlane.f32.xlu0 %v1871_v61 }
 0x7a9   : > { %v1870_v0 = vmul.f32 %v1868_v60, %v1868_v60 }
 0x7ab   : > { %v1874_v63 = vsel %vm1260_vm0, %v1870_v0, 0.0 }
 0x7ac   : > { %1875 = vadd.xlane.f32.xlu1 %v1874_v63 }
 0x835   : > { %v1873_v10 = vpop.xlane.xlu0 %1872 }
 0x836   : > { %v1877_v11 = vmul.f32 0.03125, %v1873_v10 }
 0x838   : > { %v1879_v12 = vadd.f32 1e-05, %v1877_v11 }
 0x839   : > { %v1876_v14 = vpop.xlane.xlu1 %1875 }
 0x83a   : > { %2873 = vrsqrt.f32 %v1879_v12  ;;  %v1878_v15 = vmul.f32 0.03125, %v1876_v14 }
 0x83c   : > { %v1880_v16 = vadd.f32 1e-05, %v1878_v15 }
 0x83e   : > { %2875 = vrsqrt.f32 %v1880_v16 }
 0x844   : > { %v2874_v17 = vpop.eup %2873 }
 0x845   : > { %v1883_v19 = vmul.f32 %v2874_v17, %v1867_v56 }
 0x847   : > { %v1891_v21 = vmul.f32 %v2353_v18, %v1883_v19 }
 0x848   : > { %v2876_v22 = vpop.eup %2875 }
 0x849   : > { %v1884_v23 = vmul.f32 %v2876_v22, %v1868_v60  ;;  %v1899_v24 = vadd.f32 %v2354_v20, %v1891_v21 }
 0x84b   : > { %v1892_v27 = vmul.f32 %v2353_v18, %v1884_v23  ;;  %2501 = vmatprep.mubr.msk.f32.mxu1 %vm1260_vm0, %v1899_v24 }
 0x84d   : > { %v1900_v28 = vadd.f32 %v2354_v20, %v1892_v27 }
 0x84f   : > { %2502 = vmatmul.mubr.msk.f32.vlgmr.msra.gmra.mrb[10].mxu1 %vm1260_vm0, %v1900_v28 }
 0x850   : > { %2758 = vmatpush3.bf16.msra.mxu1 %v2755_v9 }
 0x851   : > { %2760 = vmatprep.subr.bf16.mxu1 %v2759_v29 }
 0x854   : > { %2762 = vmatpush3.bf16.msra.mxu1 %v2759_v29 }
 0x855   : > { %2764 = vmatprep.subr.bf16.mxu1 %v2763_v32 }
 0x858   : > { %2766 = vmatpush3.bf16.msra.mxu1 %v2763_v32 }
 0x859   : > { %2768 = vmatprep.subr.bf16.mxu1 %v2767_v35 }
 0x85c   : > { %2770 = vmatpush3.bf16.msra.mxu1 %v2767_v35 }
 0x922   : > { %v2503_v40 = vpop.f32.mrb[10].mxu1 }
 0x923   : > { %v1990_v42 = vadd.f32 %v2503_v40, %v2355_v13  ;;  %v1984_v36 = vpop.f32.mrb[11].mxu1 }
 0x924   : > { %v1985_v37 = vadd.f32 %v2355_v13, %v1984_v36 }
 0x925   : > { %v1994_v45 = vmax.f32 %v1990_v42, 0.0 }
 0x926   : > { %v1993_v44 = vmax.f32 %v1985_v37, 0.0 }
 0x928   : > { %2520 = vmatprep.mubr.msk.f32.mxu1 %vm2010_vm3, %v1993_v44 }
 0x929   : > { %2521 = vmatmul.mubr.msk.f32.vlgmr.msra.gmra.mrb[12].mxu1 %vm2010_vm3, %v1994_v45 }
 0x9fc   : > { %v2522_v39 = vpop.f32.mrb[12].mxu1 }
 0x9fd   : > { %v2089_v41 = vadd.f32 %v2522_v39, %v2358_v38  ;;  %v2083_v47 = vpop.f32.mrb[13].mxu1 }
 0x9fe   : > { %v2084_v43 = vadd.f32 %v2358_v38, %v2083_v47 }
 0x9ff   : > { %v2093_v46 = vadd.f32 %v2089_v41, %v1900_v28 }
 0xa00   : > { %v2092_v48 = vadd.f32 %v2084_v43, %v1899_v24 }
 0xa01   : > { %v2099_v49 = vsel %vm1260_vm0, %v2093_v46, 0.0 }
 0xa02   : > { %2100 = vadd.xlane.f32.xlu1 %v2099_v49  ;;  %v2096_v50 = vsel %vm1260_vm0, %v2092_v48, 0.0 }
 0xa03   : > { %2097 = vadd.xlane.f32.xlu0 %v2096_v50 }
 0xa8f   : > { %v2101_v51 = vpop.xlane.xlu1 %2100 }
 0xa90   : > { %v2103_v52 = vmul.f32 0.03125, %v2101_v51  ;;  %v2098_v53 = vpop.xlane.xlu0 %2097 }
 0xa91   : > { %v2102_v54 = vmul.f32 0.03125, %v2098_v53 }
 0xa92   : > { %v2105_v62 = vsub.f32 %v2093_v46, %v2103_v52 }
 0xa93   : > { %v2104_v55 = vsub.f32 %v2092_v48, %v2102_v54 }
 0xa94   : > { %v2107_v56 = vmul.f32 %v2105_v62, %v2105_v62 }
 0xa95   : > { %v2106_v57 = vmul.f32 %v2104_v55, %v2104_v55 }
 0xa96   : > { %v2111_v58 = vsel %vm1260_vm0, %v2107_v56, 0.0 }
 0xa97   : > { %2112 = vadd.xlane.f32.xlu1 %v2111_v58  ;;  %v2108_v59 = vsel %vm1260_vm0, %v2106_v57, 0.0 }
 0xa98   : > { %2109 = vadd.xlane.f32.xlu0 %v2108_v59 }
 0xb24   : > { %v2113_v60 = vpop.xlane.xlu1 %2112 }
 0xb25   : > { %v2115_v61 = vmul.f32 0.03125, %v2113_v60  ;;  %v2110_v0 = vpop.xlane.xlu0 %2109 }
 0xb26   : > { %v2114_v63 = vmul.f32 0.03125, %v2110_v0 }
 0xb27   : > { %v2117_v6 = vadd.f32 1e-05, %v2115_v61 }
 0xb28   : > { %v2116_v1 = vadd.f32 1e-05, %v2114_v63 }
 0xb29   : > { %2877 = vrsqrt.f32 %v2117_v6 }
 0xb2a   : > { %2879 = vrsqrt.f32 %v2116_v1 }
 0xb33   : > { %v2878_v2 = vpop.eup %2877 }
 0xb34   : > { %v2880_v4 = vpop.eup %2879  ;;  %v2121_v5 = vmul.f32 %v2878_v2, %v2105_v62 }
 0xb35   : > { %v2120_v7 = vmul.f32 %v2880_v4, %v2104_v55 }
 0xb36   : > { %v2129_v9 = vmul.f32 %v2361_v3, %v2121_v5 }
 0xb37   : > { %v2128_v10 = vmul.f32 %v2361_v3, %v2120_v7 }
 0xb38   : > { %v2137_v12 = vadd.f32 %v2362_v8, %v2129_v9 }
 0xb39   : > { %v2136_v11 = vadd.f32 %v2362_v8, %v2128_v10 }
 0xb3a   : > { %2139 = vst.msk [vmem:[%s920_s16 + $0x8] sm:$0xff] %vm1260_vm0, %v2137_v12 }
 0xb3b   : > { %2138 = vst.msk [vmem:[%s920_s16] sm:$0xff] %vm1260_vm0, %v2136_v11 }
 0xb3c PF: > { %s39_s5 = sadd.s32 1, %s3131_s5  }
 0xb3d   : > { %p36_p7 = scmp.ge.s32.totalorder %s39_s5, 6  }
 0xb3f   :  { %38 = sbr.rel (!%p36_p7) target bundleno = 23 (0x17), region = 188 }
 0xb46   :  { %2162 = vsyncpa [#allocation3], 1 }
 0xb47   :  { %2164 = vsyncpa [#allocation3 + $0x1], 1 }
 0xb48   :  { %2165 = vsyncpa [#allocation5], 1 }
 0xb49   :  { %2166 = vsyncpa [#allocation8], 1 }
 0xb4a   :  { %2167 = vsyncpa [#allocation11], 1 }
 0xb4b   :  { %2168 = vsyncpa [#allocation14], 1 }

</bundles_post_ra>
